<compile_context>
chip_gen: v5e
topology: v5e:2x2
jax: 0.10.0
libtpu: 0.0.40
codegen_flags: <defaults>
</compile_context>

<pallas_src>
import functools
import math

import jax
import jax.numpy as jnp
from jax.experimental import pallas as pl
from jax.experimental.pallas import tpu as pltpu

# ---- small BERT config (bert-base structure, tiny sizes) --------------------
VOCAB = 100
MAX_POS = 16
TYPE_VOCAB = 2
HIDDEN = 32
NUM_HEADS = 4
HEAD_DIM = HIDDEN // NUM_HEADS
INTERMEDIATE = 64
NUM_LAYERS = 2
LN_EPS = 1e-12

# bf16 at the MXU boundary, f32 accumulation (v6e/v7x win; harmless on v5e).
MXU_DTYPE = jnp.bfloat16


# ------------------------------ in-kernel math -------------------------------
def _gelu(x):
    # TODO(synk): HF BERT uses exact erf-GELU; tanh approximation used here.
    return 0.5 * x * (1.0 + jnp.tanh(0.7978845608028654 * (x + 0.044715 * x * x * x)))


def _layernorm(h, g, b):
    mu = jnp.mean(h, axis=-1, keepdims=True)
    var = jnp.mean((h - mu) * (h - mu), axis=-1, keepdims=True)
    return (h - mu) * jax.lax.rsqrt(var + LN_EPS) * g + b


# ------------------------------ fused kernel ---------------------------------
def _fused_bert_kernel(x_ref, mask_ref, eg_ref, eb_ref,
                       wqkv_ref, bqkv_ref, wo_ref, bo_ref,
                       ln1g_ref, ln1b_ref, w1_ref, b1_ref,
                       w2_ref, b2_ref, ln2g_ref, ln2b_ref,
                       o_ref, *, B, S):
    H, nH, Dh = HIDDEN, NUM_HEADS, HEAD_DIM

    # Embedding LayerNorm (fused into the stack kernel).
    x = _layernorm(x_ref[...], eg_ref[...], eb_ref[...])        # (B*S, H) f32
    mask_add = mask_ref[...]                                    # (B, S)   f32

    for l in range(NUM_LAYERS):
        # ---- fused QKV projection: one MXU pass, bf16 operands, f32 acc ----
        qkv = jnp.dot(x.astype(MXU_DTYPE), wqkv_ref[l],
                      preferred_element_type=jnp.float32) + bqkv_ref[l]  # (B*S, 3H)

        # ---- self-attention: per-(batch, head) static lane slices ----------
        # (1/sqrt(Dh) already folded into the Q columns of w_qkv at init.)
        ctx_rows = []
        for b in range(B):
            r0 = b * S
            q_b = qkv[r0:r0 + S, 0:H]
            k_b = qkv[r0:r0 + S, H:2 * H]
            v_b = qkv[r0:r0 + S, 2 * H:3 * H]
            m_b = mask_add[b:b + 1, :]                           # (1, S) -> bcast rows
            heads = []
            for h in range(nH):
                c0 = h * Dh
                qh = q_b[:, c0:c0 + Dh]
                kh = k_b[:, c0:c0 + Dh]
                vh = v_b[:, c0:c0 + Dh]
                # q @ k^T without an explicit transpose (trans_b dot_general).
                s = jax.lax.dot_general(qh, kh, (((1,), (1,)), ((), ())),
                                        preferred_element_type=jnp.float32)
                s = s + m_b
                s = s - jnp.max(s, axis=-1, keepdims=True)
                p = jnp.exp(s)
                p = p * pl.reciprocal(jnp.sum(p, axis=-1, keepdims=True), approx=True)
                heads.append(jnp.dot(p, vh, preferred_element_type=jnp.float32))
            ctx_rows.append(jnp.concatenate(heads, axis=-1))     # (S, H)
        ctx = jnp.concatenate(ctx_rows, axis=0)                  # (B*S, H)

        # ---- output projection, residual add + LN as epilogue --------------
        attn_out = jnp.dot(ctx.astype(MXU_DTYPE), wo_ref[l],
                           preferred_element_type=jnp.float32) + bo_ref[l]
        x = _layernorm(attn_out + x, ln1g_ref[l], ln1b_ref[l])

        # ---- GELU FFN, residual add + LN as epilogue ------------------------
        hmid = jnp.dot(x.astype(MXU_DTYPE), w1_ref[l],
                       preferred_element_type=jnp.float32) + b1_ref[l]
        hmid = _gelu(hmid)
        ffn = jnp.dot(hmid.astype(MXU_DTYPE), w2_ref[l],
                      preferred_element_type=jnp.float32) + b2_ref[l]
        x = _layernorm(ffn + x, ln2g_ref[l], ln2b_ref[l])

    # CLS token (row b*S of the slab) of the last layer -> (B, H).
    o_ref[...] = jnp.concatenate([x[b * S:b * S + 1, :] for b in range(B)], axis=0)


# ----------------------------- parameter setup -------------------------------
def init_params(key):
    std = 0.02
    scale = 1.0 / math.sqrt(HEAD_DIM)

    def normal(k, shape):
        return (std * jax.random.normal(k, shape)).astype(jnp.float32)

    keys = iter(jax.random.split(key, 3 + NUM_LAYERS * 6))

    word_emb = normal(next(keys), (VOCAB, HIDDEN))
    pos_emb = normal(next(keys), (MAX_POS, HIDDEN))
    type_emb = normal(next(keys), (TYPE_VOCAB, HIDDEN))

    w_qkv, b_qkv, wo, bo = [], [], [], []
    ln1_g, ln1_b, w1, b1, w2, b2, ln2_g, ln2_b = [], [], [], [], [], [], [], []
    for _ in range(NUM_LAYERS):
        wq = normal(next(keys), (HIDDEN, HIDDEN))
        wk = normal(next(keys), (HIDDEN, HIDDEN))
        wv = normal(next(keys), (HIDDEN, HIDDEN))
        bq = jnp.zeros((HIDDEN,), jnp.float32)
        bk = jnp.zeros((HIDDEN,), jnp.float32)
        bv = jnp.zeros((HIDDEN,), jnp.float32)
        # Concatenated QKV weight; fold the 1/sqrt(Dh) scale into Q (free at init).
        w_qkv.append(jnp.concatenate([wq * scale, wk, wv], axis=1))
        b_qkv.append(jnp.concatenate([bq * scale, bk, bv]).reshape(1, 3 * HIDDEN))
        wo.append(normal(next(keys), (HIDDEN, HIDDEN)))
        bo.append(jnp.zeros((1, HIDDEN), jnp.float32))
        ln1_g.append(jnp.ones((1, HIDDEN), jnp.float32))
        ln1_b.append(jnp.zeros((1, HIDDEN), jnp.float32))
        w1.append(normal(next(keys), (HIDDEN, INTERMEDIATE)))
        b1.append(jnp.zeros((1, INTERMEDIATE), jnp.float32))
        w2.append(normal(next(keys), (INTERMEDIATE, HIDDEN)))
        b2.append(jnp.zeros((1, HIDDEN), jnp.float32))
        ln2_g.append(jnp.ones((1, HIDDEN), jnp.float32))
        ln2_b.append(jnp.zeros((1, HIDDEN), jnp.float32))

    return {
        "word_emb": word_emb, "pos_emb": pos_emb, "type_emb": type_emb,
        "emb_ln_g": jnp.ones((1, HIDDEN), jnp.float32),
        "emb_ln_b": jnp.zeros((1, HIDDEN), jnp.float32),
        # Matmul weights stored bf16 (MXU operands); biases/LN params stay f32.
        "w_qkv": jnp.stack(w_qkv).astype(MXU_DTYPE),
        "b_qkv": jnp.stack(b_qkv),
        "wo": jnp.stack(wo).astype(MXU_DTYPE),
        "bo": jnp.stack(bo),
        "ln1_g": jnp.stack(ln1_g), "ln1_b": jnp.stack(ln1_b),
        "w1": jnp.stack(w1).astype(MXU_DTYPE), "b1": jnp.stack(b1),
        "w2": jnp.stack(w2).astype(MXU_DTYPE), "b2": jnp.stack(b2),
        "ln2_g": jnp.stack(ln2_g), "ln2_b": jnp.stack(ln2_b),
    }


# ------------------------------ forward pass ---------------------------------
def bert_encoder(input_ids, attention_mask, params):
    """Returns last_hidden[:, 0] — shape (B, HIDDEN)."""
    B, S = input_ids.shape
    H = HIDDEN

    # Embedding gather (irregular vocab lookup) stays in plain JAX glue;
    # word + position + token_type(=0).
    x = (params["word_emb"][input_ids]
         + params["pos_emb"][jnp.arange(S)][None, :, :]
         + params["type_emb"][0][None, None, :]).reshape(B * S, H).astype(jnp.float32)

    # HF BERT extended attention mask: (1 - mask) * -10000, broadcast over
    # heads and query rows inside the kernel.
    mask_add = (1.0 - attention_mask.astype(jnp.float32)) * -10000.0  # (B, S)

    inputs = (x, mask_add, params["emb_ln_g"], params["emb_ln_b"],
              params["w_qkv"], params["b_qkv"], params["wo"], params["bo"],
              params["ln1_g"], params["ln1_b"], params["w1"], params["b1"],
              params["w2"], params["b2"], params["ln2_g"], params["ln2_b"])

    def full_spec(a):
        return pl.BlockSpec(a.shape, lambda i, n=a.ndim: (0,) * n)

    kern = functools.partial(_fused_bert_kernel, B=B, S=S)

    # Everything fits VMEM at these sizes -> single grid step, one kernel
    # launch for the whole stack, activations resident in VMEM.
    # TODO(synk): at real BERT-base sizes (H=768, S=512) tile the B*S rows and
    # the FFN K-dim with a grid + f32 VMEM accumulator to respect v7x's 64 MiB.
    return pl.pallas_call(
        kern,
        out_shape=jax.ShapeDtypeStruct((B, H), jnp.float32),
        grid=(1,),
        in_specs=[full_spec(a) for a in inputs],
        out_specs=pl.BlockSpec((B, H), lambda i: (0, 0)),
        compiler_params=pltpu.CompilerParams(dimension_semantics=("arbitrary",)),
    )(*inputs)


# ----------------------------------- main ------------------------------------
if __name__ == "__main__":
    key = jax.random.PRNGKey(0)
    k_param, k_ids = jax.random.split(key)

    params = init_params(k_param)

    B, S = 2, 8
    input_ids = jax.random.randint(k_ids, (B, S), 0, VOCAB, dtype=jnp.int32)
    attention_mask = jnp.array(
        [[1, 1, 1, 1, 1, 1, 1, 1],
         [1, 1, 1, 1, 1, 0, 0, 0]], dtype=jnp.int32)

    cls_out = bert_encoder(input_ids, attention_mask, params)
    cls_out = jax.block_until_ready(cls_out)

    assert cls_out.shape == (B, HIDDEN)
    assert bool(jnp.all(jnp.isfinite(cls_out)))
    print("KERNEL_OK")
</pallas_src>

<mosaic_0001>
module attributes {stable_mosaic.version = 11 : i64} {
  func.func @_fused_bert_kernel(%arg0: i32, %arg1: memref<16x32xf32, #tpu.memory_space<vmem>>, %arg2: memref<2x8xf32, #tpu.memory_space<vmem>>, %arg3: memref<1x32xf32, #tpu.memory_space<vmem>>, %arg4: memref<1x32xf32, #tpu.memory_space<vmem>>, %arg5: memref<2x32x96xbf16, #tpu.memory_space<vmem>>, %arg6: memref<2x1x96xf32, #tpu.memory_space<vmem>>, %arg7: memref<2x32x32xbf16, #tpu.memory_space<vmem>>, %arg8: memref<2x1x32xf32, #tpu.memory_space<vmem>>, %arg9: memref<2x1x32xf32, #tpu.memory_space<vmem>>, %arg10: memref<2x1x32xf32, #tpu.memory_space<vmem>>, %arg11: memref<2x32x64xbf16, #tpu.memory_space<vmem>>, %arg12: memref<2x1x64xf32, #tpu.memory_space<vmem>>, %arg13: memref<2x64x32xbf16, #tpu.memory_space<vmem>>, %arg14: memref<2x1x32xf32, #tpu.memory_space<vmem>>, %arg15: memref<2x1x32xf32, #tpu.memory_space<vmem>>, %arg16: memref<2x1x32xf32, #tpu.memory_space<vmem>>, %arg17: memref<2x32xf32, #tpu.memory_space<vmem>>) attributes {dimension_semantics = [#tpu.dimension_semantics<arbitrary>], iteration_bounds = array<i64: 1>, scalar_prefetch = 0 : i64, scratch_operands = 0 : i64, tpu.core_type = #tpu.core_type<tc>, window_params = [{pipeline_mode = #tpu.pipeline_mode<synchronous>, transform_indices = @transform_0, window_bounds = array<i64: 16, 32>}, {pipeline_mode = #tpu.pipeline_mode<synchronous>, transform_indices = @transform_1, window_bounds = array<i64: 2, 8>}, {pipeline_mode = #tpu.pipeline_mode<synchronous>, transform_indices = @transform_2, window_bounds = array<i64: 1, 32>}, {pipeline_mode = #tpu.pipeline_mode<synchronous>, transform_indices = @transform_3, window_bounds = array<i64: 1, 32>}, {pipeline_mode = #tpu.pipeline_mode<synchronous>, transform_indices = @transform_4, window_bounds = array<i64: 2, 32, 96>}, {pipeline_mode = #tpu.pipeline_mode<synchronous>, transform_indices = @transform_5, window_bounds = array<i64: 2, 1, 96>}, {pipeline_mode = #tpu.pipeline_mode<synchronous>, transform_indices = @transform_6, window_bounds = array<i64: 2, 32, 32>}, {pipeline_mode = #tpu.pipeline_mode<synchronous>, transform_indices = @transform_7, window_bounds = array<i64: 2, 1, 32>}, {pipeline_mode = #tpu.pipeline_mode<synchronous>, transform_indices = @transform_8, window_bounds = array<i64: 2, 1, 32>}, {pipeline_mode = #tpu.pipeline_mode<synchronous>, transform_indices = @transform_9, window_bounds = array<i64: 2, 1, 32>}, {pipeline_mode = #tpu.pipeline_mode<synchronous>, transform_indices = @transform_10, window_bounds = array<i64: 2, 32, 64>}, {pipeline_mode = #tpu.pipeline_mode<synchronous>, transform_indices = @transform_11, window_bounds = array<i64: 2, 1, 64>}, {pipeline_mode = #tpu.pipeline_mode<synchronous>, transform_indices = @transform_12, window_bounds = array<i64: 2, 64, 32>}, {pipeline_mode = #tpu.pipeline_mode<synchronous>, transform_indices = @transform_13, window_bounds = array<i64: 2, 1, 32>}, {pipeline_mode = #tpu.pipeline_mode<synchronous>, transform_indices = @transform_14, window_bounds = array<i64: 2, 1, 32>}, {pipeline_mode = #tpu.pipeline_mode<synchronous>, transform_indices = @transform_15, window_bounds = array<i64: 2, 1, 32>}, {pipeline_mode = #tpu.pipeline_mode<synchronous>, transform_indices = @transform_16, window_bounds = array<i64: 2, 32>}]} {
    %c0 = arith.constant 0 : index
    %c0_0 = arith.constant 0 : index
    %0 = vector.load %arg1[%c0, %c0_0] : memref<16x32xf32, #tpu.memory_space<vmem>>, vector<16x32xf32>
    %c0_1 = arith.constant 0 : index
    %c0_2 = arith.constant 0 : index
    %1 = vector.load %arg3[%c0_1, %c0_2] : memref<1x32xf32, #tpu.memory_space<vmem>>, vector<1x32xf32>
    %c0_3 = arith.constant 0 : index
    %c0_4 = arith.constant 0 : index
    %2 = vector.load %arg4[%c0_3, %c0_4] : memref<1x32xf32, #tpu.memory_space<vmem>>, vector<1x32xf32>
    %cst = arith.constant dense<0.000000e+00> : vector<16xf32>
    %3 = vector.multi_reduction <add>, %0, %cst [1] : vector<16x32xf32> to vector<16xf32>
    %4 = vector.shape_cast %3 : vector<16xf32> to vector<16x1xf32>
    %cst_5 = arith.constant 3.200000e+01 : f32
    %5 = vector.broadcast %cst_5 : f32 to vector<16x1xf32>
    %6 = arith.divf %4, %5 : vector<16x1xf32>
    %7 = vector.broadcast %6 : vector<16x1xf32> to vector<16x32xf32>
    %8 = arith.subf %0, %7 : vector<16x32xf32>
    %9 = vector.broadcast %6 : vector<16x1xf32> to vector<16x32xf32>
    %10 = arith.subf %0, %9 : vector<16x32xf32>
    %11 = arith.mulf %8, %10 : vector<16x32xf32>
    %cst_6 = arith.constant dense<0.000000e+00> : vector<16xf32>
    %12 = vector.multi_reduction <add>, %11, %cst_6 [1] : vector<16x32xf32> to vector<16xf32>
    %13 = vector.shape_cast %12 : vector<16xf32> to vector<16x1xf32>
    %cst_7 = arith.constant 3.200000e+01 : f32
    %14 = vector.broadcast %cst_7 : f32 to vector<16x1xf32>
    %15 = arith.divf %13, %14 : vector<16x1xf32>
    %16 = vector.broadcast %6 : vector<16x1xf32> to vector<16x32xf32>
    %17 = arith.subf %0, %16 : vector<16x32xf32>
    %cst_8 = arith.constant 9.99999996E-13 : f32
    %18 = vector.broadcast %cst_8 : f32 to vector<16x1xf32>
    %19 = arith.addf %15, %18 : vector<16x1xf32>
    %20 = math.rsqrt %19 : vector<16x1xf32>
    %21 = vector.broadcast %20 : vector<16x1xf32> to vector<16x32xf32>
    %22 = arith.mulf %17, %21 : vector<16x32xf32>
    %23 = vector.broadcast %1 : vector<1x32xf32> to vector<16x32xf32>
    %24 = arith.mulf %22, %23 : vector<16x32xf32>
    %25 = vector.broadcast %2 : vector<1x32xf32> to vector<16x32xf32>
    %26 = arith.addf %24, %25 : vector<16x32xf32>
    %c0_9 = arith.constant 0 : index
    %c0_10 = arith.constant 0 : index
    %27 = vector.load %arg2[%c0_9, %c0_10] : memref<2x8xf32, #tpu.memory_space<vmem>>, vector<2x8xf32>
    %28 = arith.truncf %26 : vector<16x32xf32> to vector<16x32xbf16>
    %c0_11 = arith.constant 0 : index
    %c0_12 = arith.constant 0 : index
    %c0_13 = arith.constant 0 : index
    %29 = vector.load %arg5[%c0_11, %c0_12, %c0_13] : memref<2x32x96xbf16, #tpu.memory_space<vmem>>, vector<1x32x96xbf16>
    %30 = vector.shape_cast %29 : vector<1x32x96xbf16> to vector<32x96xbf16>
    %cst_14 = arith.constant dense<0.000000e+00> : vector<16x96xf32>
    %31 = tpu.matmul %28, %30, %cst_14 {dimension_numbers = #tpu.dot_dimension_numbers<[1], [0], [0], [1], [0, 0, 1, 1], [], []>} : vector<16x32xbf16>, vector<32x96xbf16>, vector<16x96xf32> -> vector<16x96xf32>
    %c0_15 = arith.constant 0 : index
    %c0_16 = arith.constant 0 : index
    %c0_17 = arith.constant 0 : index
    %32 = vector.load %arg6[%c0_15, %c0_16, %c0_17] : memref<2x1x96xf32, #tpu.memory_space<vmem>>, vector<1x1x96xf32>
    %33 = vector.shape_cast %32 : vector<1x1x96xf32> to vector<1x96xf32>
    %34 = vector.broadcast %33 : vector<1x96xf32> to vector<16x96xf32>
    %35 = arith.addf %31, %34 : vector<16x96xf32>
    %36 = vector.extract_strided_slice %35 {offsets = [0, 0], sizes = [8, 32], strides = [1, 1]} : vector<16x96xf32> to vector<8x32xf32>
    %37 = vector.extract_strided_slice %35 {offsets = [0, 32], sizes = [8, 32], strides = [1, 1]} : vector<16x96xf32> to vector<8x32xf32>
    %38 = vector.extract_strided_slice %35 {offsets = [0, 64], sizes = [8, 32], strides = [1, 1]} : vector<16x96xf32> to vector<8x32xf32>
    %39 = vector.extract_strided_slice %27 {offsets = [0, 0], sizes = [1, 8], strides = [1, 1]} : vector<2x8xf32> to vector<1x8xf32>
    %40 = vector.extract_strided_slice %36 {offsets = [0, 0], sizes = [8, 8], strides = [1, 1]} : vector<8x32xf32> to vector<8x8xf32>
    %41 = vector.extract_strided_slice %37 {offsets = [0, 0], sizes = [8, 8], strides = [1, 1]} : vector<8x32xf32> to vector<8x8xf32>
    %42 = vector.extract_strided_slice %38 {offsets = [0, 0], sizes = [8, 8], strides = [1, 1]} : vector<8x32xf32> to vector<8x8xf32>
    %cst_18 = arith.constant dense<0.000000e+00> : vector<8x8xf32>
    %43 = tpu.matmul %40, %41, %cst_18 {dimension_numbers = #tpu.dot_dimension_numbers<[1], [1], [0], [0], [0, 0, 1, 0], [], []>} : vector<8x8xf32>, vector<8x8xf32>, vector<8x8xf32> -> vector<8x8xf32>
    %44 = vector.broadcast %39 : vector<1x8xf32> to vector<8x8xf32>
    %45 = arith.addf %43, %44 : vector<8x8xf32>
    %cst_19 = arith.constant dense<0xFF800000> : vector<8xf32>
    %46 = vector.multi_reduction <maximumf>, %45, %cst_19 [1] : vector<8x8xf32> to vector<8xf32>
    %47 = vector.shape_cast %46 : vector<8xf32> to vector<8x1xf32>
    %48 = vector.broadcast %47 : vector<8x1xf32> to vector<8x8xf32>
    %49 = arith.subf %45, %48 : vector<8x8xf32>
    %50 = math.exp %49 : vector<8x8xf32>
    %cst_20 = arith.constant dense<0.000000e+00> : vector<8xf32>
    %51 = vector.multi_reduction <add>, %50, %cst_20 [1] : vector<8x8xf32> to vector<8xf32>
    %52 = vector.shape_cast %51 : vector<8xf32> to vector<8x1xf32>
    %53 = tpu.reciprocal %52 {approx = true} : vector<8x1xf32> -> vector<8x1xf32>
    %54 = vector.broadcast %53 : vector<8x1xf32> to vector<8x8xf32>
    %55 = arith.mulf %50, %54 : vector<8x8xf32>
    %cst_21 = arith.constant dense<0.000000e+00> : vector<8x8xf32>
    %56 = tpu.matmul %55, %42, %cst_21 {dimension_numbers = #tpu.dot_dimension_numbers<[1], [0], [0], [1], [0, 0, 1, 1], [], []>} : vector<8x8xf32>, vector<8x8xf32>, vector<8x8xf32> -> vector<8x8xf32>
    %57 = vector.extract_strided_slice %36 {offsets = [0, 8], sizes = [8, 8], strides = [1, 1]} : vector<8x32xf32> to vector<8x8xf32>
    %58 = vector.extract_strided_slice %37 {offsets = [0, 8], sizes = [8, 8], strides = [1, 1]} : vector<8x32xf32> to vector<8x8xf32>
    %59 = vector.extract_strided_slice %38 {offsets = [0, 8], sizes = [8, 8], strides = [1, 1]} : vector<8x32xf32> to vector<8x8xf32>
    %cst_22 = arith.constant dense<0.000000e+00> : vector<8x8xf32>
    %60 = tpu.matmul %57, %58, %cst_22 {dimension_numbers = #tpu.dot_dimension_numbers<[1], [1], [0], [0], [0, 0, 1, 0], [], []>} : vector<8x8xf32>, vector<8x8xf32>, vector<8x8xf32> -> vector<8x8xf32>
    %61 = vector.broadcast %39 : vector<1x8xf32> to vector<8x8xf32>
    %62 = arith.addf %60, %61 : vector<8x8xf32>
    %cst_23 = arith.constant dense<0xFF800000> : vector<8xf32>
    %63 = vector.multi_reduction <maximumf>, %62, %cst_23 [1] : vector<8x8xf32> to vector<8xf32>
    %64 = vector.shape_cast %63 : vector<8xf32> to vector<8x1xf32>
    %65 = vector.broadcast %64 : vector<8x1xf32> to vector<8x8xf32>
    %66 = arith.subf %62, %65 : vector<8x8xf32>
    %67 = math.exp %66 : vector<8x8xf32>
    %cst_24 = arith.constant dense<0.000000e+00> : vector<8xf32>
    %68 = vector.multi_reduction <add>, %67, %cst_24 [1] : vector<8x8xf32> to vector<8xf32>
    %69 = vector.shape_cast %68 : vector<8xf32> to vector<8x1xf32>
    %70 = tpu.reciprocal %69 {approx = true} : vector<8x1xf32> -> vector<8x1xf32>
    %71 = vector.broadcast %70 : vector<8x1xf32> to vector<8x8xf32>
    %72 = arith.mulf %67, %71 : vector<8x8xf32>
    %cst_25 = arith.constant dense<0.000000e+00> : vector<8x8xf32>
    %73 = tpu.matmul %72, %59, %cst_25 {dimension_numbers = #tpu.dot_dimension_numbers<[1], [0], [0], [1], [0, 0, 1, 1], [], []>} : vector<8x8xf32>, vector<8x8xf32>, vector<8x8xf32> -> vector<8x8xf32>
    %74 = vector.extract_strided_slice %36 {offsets = [0, 16], sizes = [8, 8], strides = [1, 1]} : vector<8x32xf32> to vector<8x8xf32>
    %75 = vector.extract_strided_slice %37 {offsets = [0, 16], sizes = [8, 8], strides = [1, 1]} : vector<8x32xf32> to vector<8x8xf32>
    %76 = vector.extract_strided_slice %38 {offsets = [0, 16], sizes = [8, 8], strides = [1, 1]} : vector<8x32xf32> to vector<8x8xf32>
    %cst_26 = arith.constant dense<0.000000e+00> : vector<8x8xf32>
    %77 = tpu.matmul %74, %75, %cst_26 {dimension_numbers = #tpu.dot_dimension_numbers<[1], [1], [0], [0], [0, 0, 1, 0], [], []>} : vector<8x8xf32>, vector<8x8xf32>, vector<8x8xf32> -> vector<8x8xf32>
    %78 = vector.broadcast %39 : vector<1x8xf32> to vector<8x8xf32>
    %79 = arith.addf %77, %78 : vector<8x8xf32>
    %cst_27 = arith.constant dense<0xFF800000> : vector<8xf32>
    %80 = vector.multi_reduction <maximumf>, %79, %cst_27 [1] : vector<8x8xf32> to vector<8xf32>
    %81 = vector.shape_cast %80 : vector<8xf32> to vector<8x1xf32>
    %82 = vector.broadcast %81 : vector<8x1xf32> to vector<8x8xf32>
    %83 = arith.subf %79, %82 : vector<8x8xf32>
    %84 = math.exp %83 : vector<8x8xf32>
    %cst_28 = arith.constant dense<0.000000e+00> : vector<8xf32>
    %85 = vector.multi_reduction <add>, %84, %cst_28 [1] : vector<8x8xf32> to vector<8xf32>
    %86 = vector.shape_cast %85 : vector<8xf32> to vector<8x1xf32>
    %87 = tpu.reciprocal %86 {approx = true} : vector<8x1xf32> -> vector<8x1xf32>
    %88 = vector.broadcast %87 : vector<8x1xf32> to vector<8x8xf32>
    %89 = arith.mulf %84, %88 : vector<8x8xf32>
    %cst_29 = arith.constant dense<0.000000e+00> : vector<8x8xf32>
    %90 = tpu.matmul %89, %76, %cst_29 {dimension_numbers = #tpu.dot_dimension_numbers<[1], [0], [0], [1], [0, 0, 1, 1], [], []>} : vector<8x8xf32>, vector<8x8xf32>, vector<8x8xf32> -> vector<8x8xf32>
    %91 = vector.extract_strided_slice %36 {offsets = [0, 24], sizes = [8, 8], strides = [1, 1]} : vector<8x32xf32> to vector<8x8xf32>
    %92 = vector.extract_strided_slice %37 {offsets = [0, 24], sizes = [8, 8], strides = [1, 1]} : vector<8x32xf32> to vector<8x8xf32>
    %93 = vector.extract_strided_slice %38 {offsets = [0, 24], sizes = [8, 8], strides = [1, 1]} : vector<8x32xf32> to vector<8x8xf32>
    %cst_30 = arith.constant dense<0.000000e+00> : vector<8x8xf32>
    %94 = tpu.matmul %91, %92, %cst_30 {dimension_numbers = #tpu.dot_dimension_numbers<[1], [1], [0], [0], [0, 0, 1, 0], [], []>} : vector<8x8xf32>, vector<8x8xf32>, vector<8x8xf32> -> vector<8x8xf32>
    %95 = vector.broadcast %39 : vector<1x8xf32> to vector<8x8xf32>
    %96 = arith.addf %94, %95 : vector<8x8xf32>
    %cst_31 = arith.constant dense<0xFF800000> : vector<8xf32>
    %97 = vector.multi_reduction <maximumf>, %96, %cst_31 [1] : vector<8x8xf32> to vector<8xf32>
    %98 = vector.shape_cast %97 : vector<8xf32> to vector<8x1xf32>
    %99 = vector.broadcast %98 : vector<8x1xf32> to vector<8x8xf32>
    %100 = arith.subf %96, %99 : vector<8x8xf32>
    %101 = math.exp %100 : vector<8x8xf32>
    %cst_32 = arith.constant dense<0.000000e+00> : vector<8xf32>
    %102 = vector.multi_reduction <add>, %101, %cst_32 [1] : vector<8x8xf32> to vector<8xf32>
    %103 = vector.shape_cast %102 : vector<8xf32> to vector<8x1xf32>
    %104 = tpu.reciprocal %103 {approx = true} : vector<8x1xf32> -> vector<8x1xf32>
    %105 = vector.broadcast %104 : vector<8x1xf32> to vector<8x8xf32>
    %106 = arith.mulf %101, %105 : vector<8x8xf32>
    %cst_33 = arith.constant dense<0.000000e+00> : vector<8x8xf32>
    %107 = tpu.matmul %106, %93, %cst_33 {dimension_numbers = #tpu.dot_dimension_numbers<[1], [0], [0], [1], [0, 0, 1, 1], [], []>} : vector<8x8xf32>, vector<8x8xf32>, vector<8x8xf32> -> vector<8x8xf32>
    %108 = tpu.concatenate %56, %73, %90, %107 in 1 : vector<8x8xf32>, vector<8x8xf32>, vector<8x8xf32>, vector<8x8xf32> -> vector<8x32xf32>
    %109 = vector.extract_strided_slice %35 {offsets = [8, 0], sizes = [8, 32], strides = [1, 1]} : vector<16x96xf32> to vector<8x32xf32>
    %110 = vector.extract_strided_slice %35 {offsets = [8, 32], sizes = [8, 32], strides = [1, 1]} : vector<16x96xf32> to vector<8x32xf32>
    %111 = vector.extract_strided_slice %35 {offsets = [8, 64], sizes = [8, 32], strides = [1, 1]} : vector<16x96xf32> to vector<8x32xf32>
    %112 = vector.extract_strided_slice %27 {offsets = [1, 0], sizes = [1, 8], strides = [1, 1]} : vector<2x8xf32> to vector<1x8xf32>
    %113 = vector.extract_strided_slice %109 {offsets = [0, 0], sizes = [8, 8], strides = [1, 1]} : vector<8x32xf32> to vector<8x8xf32>
    %114 = vector.extract_strided_slice %110 {offsets = [0, 0], sizes = [8, 8], strides = [1, 1]} : vector<8x32xf32> to vector<8x8xf32>
    %115 = vector.extract_strided_slice %111 {offsets = [0, 0], sizes = [8, 8], strides = [1, 1]} : vector<8x32xf32> to vector<8x8xf32>
    %cst_34 = arith.constant dense<0.000000e+00> : vector<8x8xf32>
    %116 = tpu.matmul %113, %114, %cst_34 {dimension_numbers = #tpu.dot_dimension_numbers<[1], [1], [0], [0], [0, 0, 1, 0], [], []>} : vector<8x8xf32>, vector<8x8xf32>, vector<8x8xf32> -> vector<8x8xf32>
    %117 = vector.broadcast %112 : vector<1x8xf32> to vector<8x8xf32>
    %118 = arith.addf %116, %117 : vector<8x8xf32>
    %cst_35 = arith.constant dense<0xFF800000> : vector<8xf32>
    %119 = vector.multi_reduction <maximumf>, %118, %cst_35 [1] : vector<8x8xf32> to vector<8xf32>
    %120 = vector.shape_cast %119 : vector<8xf32> to vector<8x1xf32>
    %121 = vector.broadcast %120 : vector<8x1xf32> to vector<8x8xf32>
    %122 = arith.subf %118, %121 : vector<8x8xf32>
    %123 = math.exp %122 : vector<8x8xf32>
    %cst_36 = arith.constant dense<0.000000e+00> : vector<8xf32>
    %124 = vector.multi_reduction <add>, %123, %cst_36 [1] : vector<8x8xf32> to vector<8xf32>
    %125 = vector.shape_cast %124 : vector<8xf32> to vector<8x1xf32>
    %126 = tpu.reciprocal %125 {approx = true} : vector<8x1xf32> -> vector<8x1xf32>
    %127 = vector.broadcast %126 : vector<8x1xf32> to vector<8x8xf32>
    %128 = arith.mulf %123, %127 : vector<8x8xf32>
    %cst_37 = arith.constant dense<0.000000e+00> : vector<8x8xf32>
    %129 = tpu.matmul %128, %115, %cst_37 {dimension_numbers = #tpu.dot_dimension_numbers<[1], [0], [0], [1], [0, 0, 1, 1], [], []>} : vector<8x8xf32>, vector<8x8xf32>, vector<8x8xf32> -> vector<8x8xf32>
    %130 = vector.extract_strided_slice %109 {offsets = [0, 8], sizes = [8, 8], strides = [1, 1]} : vector<8x32xf32> to vector<8x8xf32>
    %131 = vector.extract_strided_slice %110 {offsets = [0, 8], sizes = [8, 8], strides = [1, 1]} : vector<8x32xf32> to vector<8x8xf32>
    %132 = vector.extract_strided_slice %111 {offsets = [0, 8], sizes = [8, 8], strides = [1, 1]} : vector<8x32xf32> to vector<8x8xf32>
    %cst_38 = arith.constant dense<0.000000e+00> : vector<8x8xf32>
    %133 = tpu.matmul %130, %131, %cst_38 {dimension_numbers = #tpu.dot_dimension_numbers<[1], [1], [0], [0], [0, 0, 1, 0], [], []>} : vector<8x8xf32>, vector<8x8xf32>, vector<8x8xf32> -> vector<8x8xf32>
    %134 = vector.broadcast %112 : vector<1x8xf32> to vector<8x8xf32>
    %135 = arith.addf %133, %134 : vector<8x8xf32>
    %cst_39 = arith.constant dense<0xFF800000> : vector<8xf32>
    %136 = vector.multi_reduction <maximumf>, %135, %cst_39 [1] : vector<8x8xf32> to vector<8xf32>
    %137 = vector.shape_cast %136 : vector<8xf32> to vector<8x1xf32>
    %138 = vector.broadcast %137 : vector<8x1xf32> to vector<8x8xf32>
    %139 = arith.subf %135, %138 : vector<8x8xf32>
    %140 = math.exp %139 : vector<8x8xf32>
    %cst_40 = arith.constant dense<0.000000e+00> : vector<8xf32>
    %141 = vector.multi_reduction <add>, %140, %cst_40 [1] : vector<8x8xf32> to vector<8xf32>
    %142 = vector.shape_cast %141 : vector<8xf32> to vector<8x1xf32>
    %143 = tpu.reciprocal %142 {approx = true} : vector<8x1xf32> -> vector<8x1xf32>
    %144 = vector.broadcast %143 : vector<8x1xf32> to vector<8x8xf32>
    %145 = arith.mulf %140, %144 : vector<8x8xf32>
    %cst_41 = arith.constant dense<0.000000e+00> : vector<8x8xf32>
    %146 = tpu.matmul %145, %132, %cst_41 {dimension_numbers = #tpu.dot_dimension_numbers<[1], [0], [0], [1], [0, 0, 1, 1], [], []>} : vector<8x8xf32>, vector<8x8xf32>, vector<8x8xf32> -> vector<8x8xf32>
    %147 = vector.extract_strided_slice %109 {offsets = [0, 16], sizes = [8, 8], strides = [1, 1]} : vector<8x32xf32> to vector<8x8xf32>
    %148 = vector.extract_strided_slice %110 {offsets = [0, 16], sizes = [8, 8], strides = [1, 1]} : vector<8x32xf32> to vector<8x8xf32>
    %149 = vector.extract_strided_slice %111 {offsets = [0, 16], sizes = [8, 8], strides = [1, 1]} : vector<8x32xf32> to vector<8x8xf32>
    %cst_42 = arith.constant dense<0.000000e+00> : vector<8x8xf32>
    %150 = tpu.matmul %147, %148, %cst_42 {dimension_numbers = #tpu.dot_dimension_numbers<[1], [1], [0], [0], [0, 0, 1, 0], [], []>} : vector<8x8xf32>, vector<8x8xf32>, vector<8x8xf32> -> vector<8x8xf32>
    %151 = vector.broadcast %112 : vector<1x8xf32> to vector<8x8xf32>
    %152 = arith.addf %150, %151 : vector<8x8xf32>
    %cst_43 = arith.constant dense<0xFF800000> : vector<8xf32>
    %153 = vector.multi_reduction <maximumf>, %152, %cst_43 [1] : vector<8x8xf32> to vector<8xf32>
    %154 = vector.shape_cast %153 : vector<8xf32> to vector<8x1xf32>
    %155 = vector.broadcast %154 : vector<8x1xf32> to vector<8x8xf32>
    %156 = arith.subf %152, %155 : vector<8x8xf32>
    %157 = math.exp %156 : vector<8x8xf32>
    %cst_44 = arith.constant dense<0.000000e+00> : vector<8xf32>
    %158 = vector.multi_reduction <add>, %157, %cst_44 [1] : vector<8x8xf32> to vector<8xf32>
    %159 = vector.shape_cast %158 : vector<8xf32> to vector<8x1xf32>
    %160 = tpu.reciprocal %159 {approx = true} : vector<8x1xf32> -> vector<8x1xf32>
    %161 = vector.broadcast %160 : vector<8x1xf32> to vector<8x8xf32>
    %162 = arith.mulf %157, %161 : vector<8x8xf32>
    %cst_45 = arith.constant dense<0.000000e+00> : vector<8x8xf32>
    %163 = tpu.matmul %162, %149, %cst_45 {dimension_numbers = #tpu.dot_dimension_numbers<[1], [0], [0], [1], [0, 0, 1, 1], [], []>} : vector<8x8xf32>, vector<8x8xf32>, vector<8x8xf32> -> vector<8x8xf32>
    %164 = vector.extract_strided_slice %109 {offsets = [0, 24], sizes = [8, 8], strides = [1, 1]} : vector<8x32xf32> to vector<8x8xf32>
    %165 = vector.extract_strided_slice %110 {offsets = [0, 24], sizes = [8, 8], strides = [1, 1]} : vector<8x32xf32> to vector<8x8xf32>
    %166 = vector.extract_strided_slice %111 {offsets = [0, 24], sizes = [8, 8], strides = [1, 1]} : vector<8x32xf32> to vector<8x8xf32>
    %cst_46 = arith.constant dense<0.000000e+00> : vector<8x8xf32>
    %167 = tpu.matmul %164, %165, %cst_46 {dimension_numbers = #tpu.dot_dimension_numbers<[1], [1], [0], [0], [0, 0, 1, 0], [], []>} : vector<8x8xf32>, vector<8x8xf32>, vector<8x8xf32> -> vector<8x8xf32>
    %168 = vector.broadcast %112 : vector<1x8xf32> to vector<8x8xf32>
    %169 = arith.addf %167, %168 : vector<8x8xf32>
    %cst_47 = arith.constant dense<0xFF800000> : vector<8xf32>
    %170 = vector.multi_reduction <maximumf>, %169, %cst_47 [1] : vector<8x8xf32> to vector<8xf32>
    %171 = vector.shape_cast %170 : vector<8xf32> to vector<8x1xf32>
    %172 = vector.broadcast %171 : vector<8x1xf32> to vector<8x8xf32>
    %173 = arith.subf %169, %172 : vector<8x8xf32>
    %174 = math.exp %173 : vector<8x8xf32>
    %cst_48 = arith.constant dense<0.000000e+00> : vector<8xf32>
    %175 = vector.multi_reduction <add>, %174, %cst_48 [1] : vector<8x8xf32> to vector<8xf32>
    %176 = vector.shape_cast %175 : vector<8xf32> to vector<8x1xf32>
    %177 = tpu.reciprocal %176 {approx = true} : vector<8x1xf32> -> vector<8x1xf32>
    %178 = vector.broadcast %177 : vector<8x1xf32> to vector<8x8xf32>
    %179 = arith.mulf %174, %178 : vector<8x8xf32>
    %cst_49 = arith.constant dense<0.000000e+00> : vector<8x8xf32>
    %180 = tpu.matmul %179, %166, %cst_49 {dimension_numbers = #tpu.dot_dimension_numbers<[1], [0], [0], [1], [0, 0, 1, 1], [], []>} : vector<8x8xf32>, vector<8x8xf32>, vector<8x8xf32> -> vector<8x8xf32>
    %181 = tpu.concatenate %129, %146, %163, %180 in 1 : vector<8x8xf32>, vector<8x8xf32>, vector<8x8xf32>, vector<8x8xf32> -> vector<8x32xf32>
    %182 = tpu.concatenate %108, %181 in 0 : vector<8x32xf32>, vector<8x32xf32> -> vector<16x32xf32>
    %183 = arith.truncf %182 : vector<16x32xf32> to vector<16x32xbf16>
    %c0_50 = arith.constant 0 : index
    %c0_51 = arith.constant 0 : index
    %c0_52 = arith.constant 0 : index
    %184 = vector.load %arg7[%c0_50, %c0_51, %c0_52] : memref<2x32x32xbf16, #tpu.memory_space<vmem>>, vector<1x32x32xbf16>
    %185 = vector.shape_cast %184 : vector<1x32x32xbf16> to vector<32x32xbf16>
    %cst_53 = arith.constant dense<0.000000e+00> : vector<16x32xf32>
    %186 = tpu.matmul %183, %185, %cst_53 {dimension_numbers = #tpu.dot_dimension_numbers<[1], [0], [0], [1], [0, 0, 1, 1], [], []>} : vector<16x32xbf16>, vector<32x32xbf16>, vector<16x32xf32> -> vector<16x32xf32>
    %c0_54 = arith.constant 0 : index
    %c0_55 = arith.constant 0 : index
    %c0_56 = arith.constant 0 : index
    %187 = vector.load %arg8[%c0_54, %c0_55, %c0_56] : memref<2x1x32xf32, #tpu.memory_space<vmem>>, vector<1x1x32xf32>
    %188 = vector.shape_cast %187 : vector<1x1x32xf32> to vector<1x32xf32>
    %189 = vector.broadcast %188 : vector<1x32xf32> to vector<16x32xf32>
    %190 = arith.addf %186, %189 : vector<16x32xf32>
    %191 = arith.addf %190, %26 : vector<16x32xf32>
    %c0_57 = arith.constant 0 : index
    %c0_58 = arith.constant 0 : index
    %c0_59 = arith.constant 0 : index
    %192 = vector.load %arg9[%c0_57, %c0_58, %c0_59] : memref<2x1x32xf32, #tpu.memory_space<vmem>>, vector<1x1x32xf32>
    %193 = vector.shape_cast %192 : vector<1x1x32xf32> to vector<1x32xf32>
    %c0_60 = arith.constant 0 : index
    %c0_61 = arith.constant 0 : index
    %c0_62 = arith.constant 0 : index
    %194 = vector.load %arg10[%c0_60, %c0_61, %c0_62] : memref<2x1x32xf32, #tpu.memory_space<vmem>>, vector<1x1x32xf32>
    %195 = vector.shape_cast %194 : vector<1x1x32xf32> to vector<1x32xf32>
    %cst_63 = arith.constant dense<0.000000e+00> : vector<16xf32>
    %196 = vector.multi_reduction <add>, %191, %cst_63 [1] : vector<16x32xf32> to vector<16xf32>
    %197 = vector.shape_cast %196 : vector<16xf32> to vector<16x1xf32>
    %cst_64 = arith.constant 3.200000e+01 : f32
    %198 = vector.broadcast %cst_64 : f32 to vector<16x1xf32>
    %199 = arith.divf %197, %198 : vector<16x1xf32>
    %200 = vector.broadcast %199 : vector<16x1xf32> to vector<16x32xf32>
    %201 = arith.subf %191, %200 : vector<16x32xf32>
    %202 = vector.broadcast %199 : vector<16x1xf32> to vector<16x32xf32>
    %203 = arith.subf %191, %202 : vector<16x32xf32>
    %204 = arith.mulf %201, %203 : vector<16x32xf32>
    %cst_65 = arith.constant dense<0.000000e+00> : vector<16xf32>
    %205 = vector.multi_reduction <add>, %204, %cst_65 [1] : vector<16x32xf32> to vector<16xf32>
    %206 = vector.shape_cast %205 : vector<16xf32> to vector<16x1xf32>
    %cst_66 = arith.constant 3.200000e+01 : f32
    %207 = vector.broadcast %cst_66 : f32 to vector<16x1xf32>
    %208 = arith.divf %206, %207 : vector<16x1xf32>
    %209 = vector.broadcast %199 : vector<16x1xf32> to vector<16x32xf32>
    %210 = arith.subf %191, %209 : vector<16x32xf32>
    %cst_67 = arith.constant 9.99999996E-13 : f32
    %211 = vector.broadcast %cst_67 : f32 to vector<16x1xf32>
    %212 = arith.addf %208, %211 : vector<16x1xf32>
    %213 = math.rsqrt %212 : vector<16x1xf32>
    %214 = vector.broadcast %213 : vector<16x1xf32> to vector<16x32xf32>
    %215 = arith.mulf %210, %214 : vector<16x32xf32>
    %216 = vector.broadcast %193 : vector<1x32xf32> to vector<16x32xf32>
    %217 = arith.mulf %215, %216 : vector<16x32xf32>
    %218 = vector.broadcast %195 : vector<1x32xf32> to vector<16x32xf32>
    %219 = arith.addf %217, %218 : vector<16x32xf32>
    %220 = arith.truncf %219 : vector<16x32xf32> to vector<16x32xbf16>
    %c0_68 = arith.constant 0 : index
    %c0_69 = arith.constant 0 : index
    %c0_70 = arith.constant 0 : index
    %221 = vector.load %arg11[%c0_68, %c0_69, %c0_70] : memref<2x32x64xbf16, #tpu.memory_space<vmem>>, vector<1x32x64xbf16>
    %222 = vector.shape_cast %221 : vector<1x32x64xbf16> to vector<32x64xbf16>
    %cst_71 = arith.constant dense<0.000000e+00> : vector<16x64xf32>
    %223 = tpu.matmul %220, %222, %cst_71 {dimension_numbers = #tpu.dot_dimension_numbers<[1], [0], [0], [1], [0, 0, 1, 1], [], []>} : vector<16x32xbf16>, vector<32x64xbf16>, vector<16x64xf32> -> vector<16x64xf32>
    %c0_72 = arith.constant 0 : index
    %c0_73 = arith.constant 0 : index
    %c0_74 = arith.constant 0 : index
    %224 = vector.load %arg12[%c0_72, %c0_73, %c0_74] : memref<2x1x64xf32, #tpu.memory_space<vmem>>, vector<1x1x64xf32>
    %225 = vector.shape_cast %224 : vector<1x1x64xf32> to vector<1x64xf32>
    %226 = vector.broadcast %225 : vector<1x64xf32> to vector<16x64xf32>
    %227 = arith.addf %223, %226 : vector<16x64xf32>
    %cst_75 = arith.constant 5.000000e-01 : f32
    %228 = vector.broadcast %cst_75 : f32 to vector<16x64xf32>
    %229 = arith.mulf %228, %227 : vector<16x64xf32>
    %cst_76 = arith.constant 4.471500e-02 : f32
    %230 = vector.broadcast %cst_76 : f32 to vector<16x64xf32>
    %231 = arith.mulf %230, %227 : vector<16x64xf32>
    %232 = arith.mulf %231, %227 : vector<16x64xf32>
    %233 = arith.mulf %232, %227 : vector<16x64xf32>
    %234 = arith.addf %227, %233 : vector<16x64xf32>
    %cst_77 = arith.constant 0.797884583 : f32
    %235 = vector.broadcast %cst_77 : f32 to vector<16x64xf32>
    %236 = arith.mulf %235, %234 : vector<16x64xf32>
    %237 = math.tanh %236 : vector<16x64xf32>
    %cst_78 = arith.constant 1.000000e+00 : f32
    %238 = vector.broadcast %cst_78 : f32 to vector<16x64xf32>
    %239 = arith.addf %238, %237 : vector<16x64xf32>
    %240 = arith.mulf %229, %239 : vector<16x64xf32>
    %241 = arith.truncf %240 : vector<16x64xf32> to vector<16x64xbf16>
    %c0_79 = arith.constant 0 : index
    %c0_80 = arith.constant 0 : index
    %c0_81 = arith.constant 0 : index
    %242 = vector.load %arg13[%c0_79, %c0_80, %c0_81] : memref<2x64x32xbf16, #tpu.memory_space<vmem>>, vector<1x64x32xbf16>
    %243 = vector.shape_cast %242 : vector<1x64x32xbf16> to vector<64x32xbf16>
    %cst_82 = arith.constant dense<0.000000e+00> : vector<16x32xf32>
    %244 = tpu.matmul %241, %243, %cst_82 {dimension_numbers = #tpu.dot_dimension_numbers<[1], [0], [0], [1], [0, 0, 1, 1], [], []>} : vector<16x64xbf16>, vector<64x32xbf16>, vector<16x32xf32> -> vector<16x32xf32>
    %c0_83 = arith.constant 0 : index
    %c0_84 = arith.constant 0 : index
    %c0_85 = arith.constant 0 : index
    %245 = vector.load %arg14[%c0_83, %c0_84, %c0_85] : memref<2x1x32xf32, #tpu.memory_space<vmem>>, vector<1x1x32xf32>
    %246 = vector.shape_cast %245 : vector<1x1x32xf32> to vector<1x32xf32>
    %247 = vector.broadcast %246 : vector<1x32xf32> to vector<16x32xf32>
    %248 = arith.addf %244, %247 : vector<16x32xf32>
    %249 = arith.addf %248, %219 : vector<16x32xf32>
    %c0_86 = arith.constant 0 : index
    %c0_87 = arith.constant 0 : index
    %c0_88 = arith.constant 0 : index
    %250 = vector.load %arg15[%c0_86, %c0_87, %c0_88] : memref<2x1x32xf32, #tpu.memory_space<vmem>>, vector<1x1x32xf32>
    %251 = vector.shape_cast %250 : vector<1x1x32xf32> to vector<1x32xf32>
    %c0_89 = arith.constant 0 : index
    %c0_90 = arith.constant 0 : index
    %c0_91 = arith.constant 0 : index
    %252 = vector.load %arg16[%c0_89, %c0_90, %c0_91] : memref<2x1x32xf32, #tpu.memory_space<vmem>>, vector<1x1x32xf32>
    %253 = vector.shape_cast %252 : vector<1x1x32xf32> to vector<1x32xf32>
    %cst_92 = arith.constant dense<0.000000e+00> : vector<16xf32>
    %254 = vector.multi_reduction <add>, %249, %cst_92 [1] : vector<16x32xf32> to vector<16xf32>
    %255 = vector.shape_cast %254 : vector<16xf32> to vector<16x1xf32>
    %cst_93 = arith.constant 3.200000e+01 : f32
    %256 = vector.broadcast %cst_93 : f32 to vector<16x1xf32>
    %257 = arith.divf %255, %256 : vector<16x1xf32>
    %258 = vector.broadcast %257 : vector<16x1xf32> to vector<16x32xf32>
    %259 = arith.subf %249, %258 : vector<16x32xf32>
    %260 = vector.broadcast %257 : vector<16x1xf32> to vector<16x32xf32>
    %261 = arith.subf %249, %260 : vector<16x32xf32>
    %262 = arith.mulf %259, %261 : vector<16x32xf32>
    %cst_94 = arith.constant dense<0.000000e+00> : vector<16xf32>
    %263 = vector.multi_reduction <add>, %262, %cst_94 [1] : vector<16x32xf32> to vector<16xf32>
    %264 = vector.shape_cast %263 : vector<16xf32> to vector<16x1xf32>
    %cst_95 = arith.constant 3.200000e+01 : f32
    %265 = vector.broadcast %cst_95 : f32 to vector<16x1xf32>
    %266 = arith.divf %264, %265 : vector<16x1xf32>
    %267 = vector.broadcast %257 : vector<16x1xf32> to vector<16x32xf32>
    %268 = arith.subf %249, %267 : vector<16x32xf32>
    %cst_96 = arith.constant 9.99999996E-13 : f32
    %269 = vector.broadcast %cst_96 : f32 to vector<16x1xf32>
    %270 = arith.addf %266, %269 : vector<16x1xf32>
    %271 = math.rsqrt %270 : vector<16x1xf32>
    %272 = vector.broadcast %271 : vector<16x1xf32> to vector<16x32xf32>
    %273 = arith.mulf %268, %272 : vector<16x32xf32>
    %274 = vector.broadcast %251 : vector<1x32xf32> to vector<16x32xf32>
    %275 = arith.mulf %273, %274 : vector<16x32xf32>
    %276 = vector.broadcast %253 : vector<1x32xf32> to vector<16x32xf32>
    %277 = arith.addf %275, %276 : vector<16x32xf32>
    %278 = arith.truncf %277 : vector<16x32xf32> to vector<16x32xbf16>
    %c1 = arith.constant 1 : index
    %c0_97 = arith.constant 0 : index
    %c0_98 = arith.constant 0 : index
    %279 = vector.load %arg5[%c1, %c0_97, %c0_98] : memref<2x32x96xbf16, #tpu.memory_space<vmem>>, vector<1x32x96xbf16>
    %280 = vector.shape_cast %279 : vector<1x32x96xbf16> to vector<32x96xbf16>
    %cst_99 = arith.constant dense<0.000000e+00> : vector<16x96xf32>
    %281 = tpu.matmul %278, %280, %cst_99 {dimension_numbers = #tpu.dot_dimension_numbers<[1], [0], [0], [1], [0, 0, 1, 1], [], []>} : vector<16x32xbf16>, vector<32x96xbf16>, vector<16x96xf32> -> vector<16x96xf32>
    %c1_100 = arith.constant 1 : index
    %c0_101 = arith.constant 0 : index
    %c0_102 = arith.constant 0 : index
    %282 = vector.load %arg6[%c1_100, %c0_101, %c0_102] : memref<2x1x96xf32, #tpu.memory_space<vmem>>, vector<1x1x96xf32>
    %283 = vector.shape_cast %282 : vector<1x1x96xf32> to vector<1x96xf32>
    %284 = vector.broadcast %283 : vector<1x96xf32> to vector<16x96xf32>
    %285 = arith.addf %281, %284 : vector<16x96xf32>
    %286 = vector.extract_strided_slice %285 {offsets = [0, 0], sizes = [8, 32], strides = [1, 1]} : vector<16x96xf32> to vector<8x32xf32>
    %287 = vector.extract_strided_slice %285 {offsets = [0, 32], sizes = [8, 32], strides = [1, 1]} : vector<16x96xf32> to vector<8x32xf32>
    %288 = vector.extract_strided_slice %285 {offsets = [0, 64], sizes = [8, 32], strides = [1, 1]} : vector<16x96xf32> to vector<8x32xf32>
    %289 = vector.extract_strided_slice %27 {offsets = [0, 0], sizes = [1, 8], strides = [1, 1]} : vector<2x8xf32> to vector<1x8xf32>
    %290 = vector.extract_strided_slice %286 {offsets = [0, 0], sizes = [8, 8], strides = [1, 1]} : vector<8x32xf32> to vector<8x8xf32>
    %291 = vector.extract_strided_slice %287 {offsets = [0, 0], sizes = [8, 8], strides = [1, 1]} : vector<8x32xf32> to vector<8x8xf32>
    %292 = vector.extract_strided_slice %288 {offsets = [0, 0], sizes = [8, 8], strides = [1, 1]} : vector<8x32xf32> to vector<8x8xf32>
    %cst_103 = arith.constant dense<0.000000e+00> : vector<8x8xf32>
    %293 = tpu.matmul %290, %291, %cst_103 {dimension_numbers = #tpu.dot_dimension_numbers<[1], [1], [0], [0], [0, 0, 1, 0], [], []>} : vector<8x8xf32>, vector<8x8xf32>, vector<8x8xf32> -> vector<8x8xf32>
    %294 = vector.broadcast %289 : vector<1x8xf32> to vector<8x8xf32>
    %295 = arith.addf %293, %294 : vector<8x8xf32>
    %cst_104 = arith.constant dense<0xFF800000> : vector<8xf32>
    %296 = vector.multi_reduction <maximumf>, %295, %cst_104 [1] : vector<8x8xf32> to vector<8xf32>
    %297 = vector.shape_cast %296 : vector<8xf32> to vector<8x1xf32>
    %298 = vector.broadcast %297 : vector<8x1xf32> to vector<8x8xf32>
    %299 = arith.subf %295, %298 : vector<8x8xf32>
    %300 = math.exp %299 : vector<8x8xf32>
    %cst_105 = arith.constant dense<0.000000e+00> : vector<8xf32>
    %301 = vector.multi_reduction <add>, %300, %cst_105 [1] : vector<8x8xf32> to vector<8xf32>
    %302 = vector.shape_cast %301 : vector<8xf32> to vector<8x1xf32>
    %303 = tpu.reciprocal %302 {approx = true} : vector<8x1xf32> -> vector<8x1xf32>
    %304 = vector.broadcast %303 : vector<8x1xf32> to vector<8x8xf32>
    %305 = arith.mulf %300, %304 : vector<8x8xf32>
    %cst_106 = arith.constant dense<0.000000e+00> : vector<8x8xf32>
    %306 = tpu.matmul %305, %292, %cst_106 {dimension_numbers = #tpu.dot_dimension_numbers<[1], [0], [0], [1], [0, 0, 1, 1], [], []>} : vector<8x8xf32>, vector<8x8xf32>, vector<8x8xf32> -> vector<8x8xf32>
    %307 = vector.extract_strided_slice %286 {offsets = [0, 8], sizes = [8, 8], strides = [1, 1]} : vector<8x32xf32> to vector<8x8xf32>
    %308 = vector.extract_strided_slice %287 {offsets = [0, 8], sizes = [8, 8], strides = [1, 1]} : vector<8x32xf32> to vector<8x8xf32>
    %309 = vector.extract_strided_slice %288 {offsets = [0, 8], sizes = [8, 8], strides = [1, 1]} : vector<8x32xf32> to vector<8x8xf32>
    %cst_107 = arith.constant dense<0.000000e+00> : vector<8x8xf32>
    %310 = tpu.matmul %307, %308, %cst_107 {dimension_numbers = #tpu.dot_dimension_numbers<[1], [1], [0], [0], [0, 0, 1, 0], [], []>} : vector<8x8xf32>, vector<8x8xf32>, vector<8x8xf32> -> vector<8x8xf32>
    %311 = vector.broadcast %289 : vector<1x8xf32> to vector<8x8xf32>
    %312 = arith.addf %310, %311 : vector<8x8xf32>
    %cst_108 = arith.constant dense<0xFF800000> : vector<8xf32>
    %313 = vector.multi_reduction <maximumf>, %312, %cst_108 [1] : vector<8x8xf32> to vector<8xf32>
    %314 = vector.shape_cast %313 : vector<8xf32> to vector<8x1xf32>
    %315 = vector.broadcast %314 : vector<8x1xf32> to vector<8x8xf32>
    %316 = arith.subf %312, %315 : vector<8x8xf32>
    %317 = math.exp %316 : vector<8x8xf32>
    %cst_109 = arith.constant dense<0.000000e+00> : vector<8xf32>
    %318 = vector.multi_reduction <add>, %317, %cst_109 [1] : vector<8x8xf32> to vector<8xf32>
    %319 = vector.shape_cast %318 : vector<8xf32> to vector<8x1xf32>
    %320 = tpu.reciprocal %319 {approx = true} : vector<8x1xf32> -> vector<8x1xf32>
    %321 = vector.broadcast %320 : vector<8x1xf32> to vector<8x8xf32>
    %322 = arith.mulf %317, %321 : vector<8x8xf32>
    %cst_110 = arith.constant dense<0.000000e+00> : vector<8x8xf32>
    %323 = tpu.matmul %322, %309, %cst_110 {dimension_numbers = #tpu.dot_dimension_numbers<[1], [0], [0], [1], [0, 0, 1, 1], [], []>} : vector<8x8xf32>, vector<8x8xf32>, vector<8x8xf32> -> vector<8x8xf32>
    %324 = vector.extract_strided_slice %286 {offsets = [0, 16], sizes = [8, 8], strides = [1, 1]} : vector<8x32xf32> to vector<8x8xf32>
    %325 = vector.extract_strided_slice %287 {offsets = [0, 16], sizes = [8, 8], strides = [1, 1]} : vector<8x32xf32> to vector<8x8xf32>
    %326 = vector.extract_strided_slice %288 {offsets = [0, 16], sizes = [8, 8], strides = [1, 1]} : vector<8x32xf32> to vector<8x8xf32>
    %cst_111 = arith.constant dense<0.000000e+00> : vector<8x8xf32>
    %327 = tpu.matmul %324, %325, %cst_111 {dimension_numbers = #tpu.dot_dimension_numbers<[1], [1], [0], [0], [0, 0, 1, 0], [], []>} : vector<8x8xf32>, vector<8x8xf32>, vector<8x8xf32> -> vector<8x8xf32>
    %328 = vector.broadcast %289 : vector<1x8xf32> to vector<8x8xf32>
    %329 = arith.addf %327, %328 : vector<8x8xf32>
    %cst_112 = arith.constant dense<0xFF800000> : vector<8xf32>
    %330 = vector.multi_reduction <maximumf>, %329, %cst_112 [1] : vector<8x8xf32> to vector<8xf32>
    %331 = vector.shape_cast %330 : vector<8xf32> to vector<8x1xf32>
    %332 = vector.broadcast %331 : vector<8x1xf32> to vector<8x8xf32>
    %333 = arith.subf %329, %332 : vector<8x8xf32>
    %334 = math.exp %333 : vector<8x8xf32>
    %cst_113 = arith.constant dense<0.000000e+00> : vector<8xf32>
    %335 = vector.multi_reduction <add>, %334, %cst_113 [1] : vector<8x8xf32> to vector<8xf32>
    %336 = vector.shape_cast %335 : vector<8xf32> to vector<8x1xf32>
    %337 = tpu.reciprocal %336 {approx = true} : vector<8x1xf32> -> vector<8x1xf32>
    %338 = vector.broadcast %337 : vector<8x1xf32> to vector<8x8xf32>
    %339 = arith.mulf %334, %338 : vector<8x8xf32>
    %cst_114 = arith.constant dense<0.000000e+00> : vector<8x8xf32>
    %340 = tpu.matmul %339, %326, %cst_114 {dimension_numbers = #tpu.dot_dimension_numbers<[1], [0], [0], [1], [0, 0, 1, 1], [], []>} : vector<8x8xf32>, vector<8x8xf32>, vector<8x8xf32> -> vector<8x8xf32>
    %341 = vector.extract_strided_slice %286 {offsets = [0, 24], sizes = [8, 8], strides = [1, 1]} : vector<8x32xf32> to vector<8x8xf32>
    %342 = vector.extract_strided_slice %287 {offsets = [0, 24], sizes = [8, 8], strides = [1, 1]} : vector<8x32xf32> to vector<8x8xf32>
    %343 = vector.extract_strided_slice %288 {offsets = [0, 24], sizes = [8, 8], strides = [1, 1]} : vector<8x32xf32> to vector<8x8xf32>
    %cst_115 = arith.constant dense<0.000000e+00> : vector<8x8xf32>
    %344 = tpu.matmul %341, %342, %cst_115 {dimension_numbers = #tpu.dot_dimension_numbers<[1], [1], [0], [0], [0, 0, 1, 0], [], []>} : vector<8x8xf32>, vector<8x8xf32>, vector<8x8xf32> -> vector<8x8xf32>
    %345 = vector.broadcast %289 : vector<1x8xf32> to vector<8x8xf32>
    %346 = arith.addf %344, %345 : vector<8x8xf32>
    %cst_116 = arith.constant dense<0xFF800000> : vector<8xf32>
    %347 = vector.multi_reduction <maximumf>, %346, %cst_116 [1] : vector<8x8xf32> to vector<8xf32>
    %348 = vector.shape_cast %347 : vector<8xf32> to vector<8x1xf32>
    %349 = vector.broadcast %348 : vector<8x1xf32> to vector<8x8xf32>
    %350 = arith.subf %346, %349 : vector<8x8xf32>
    %351 = math.exp %350 : vector<8x8xf32>
    %cst_117 = arith.constant dense<0.000000e+00> : vector<8xf32>
    %352 = vector.multi_reduction <add>, %351, %cst_117 [1] : vector<8x8xf32> to vector<8xf32>
    %353 = vector.shape_cast %352 : vector<8xf32> to vector<8x1xf32>
    %354 = tpu.reciprocal %353 {approx = true} : vector<8x1xf32> -> vector<8x1xf32>
    %355 = vector.broadcast %354 : vector<8x1xf32> to vector<8x8xf32>
    %356 = arith.mulf %351, %355 : vector<8x8xf32>
    %cst_118 = arith.constant dense<0.000000e+00> : vector<8x8xf32>
    %357 = tpu.matmul %356, %343, %cst_118 {dimension_numbers = #tpu.dot_dimension_numbers<[1], [0], [0], [1], [0, 0, 1, 1], [], []>} : vector<8x8xf32>, vector<8x8xf32>, vector<8x8xf32> -> vector<8x8xf32>
    %358 = tpu.concatenate %306, %323, %340, %357 in 1 : vector<8x8xf32>, vector<8x8xf32>, vector<8x8xf32>, vector<8x8xf32> -> vector<8x32xf32>
    %359 = vector.extract_strided_slice %285 {offsets = [8, 0], sizes = [8, 32], strides = [1, 1]} : vector<16x96xf32> to vector<8x32xf32>
    %360 = vector.extract_strided_slice %285 {offsets = [8, 32], sizes = [8, 32], strides = [1, 1]} : vector<16x96xf32> to vector<8x32xf32>
    %361 = vector.extract_strided_slice %285 {offsets = [8, 64], sizes = [8, 32], strides = [1, 1]} : vector<16x96xf32> to vector<8x32xf32>
    %362 = vector.extract_strided_slice %27 {offsets = [1, 0], sizes = [1, 8], strides = [1, 1]} : vector<2x8xf32> to vector<1x8xf32>
    %363 = vector.extract_strided_slice %359 {offsets = [0, 0], sizes = [8, 8], strides = [1, 1]} : vector<8x32xf32> to vector<8x8xf32>
    %364 = vector.extract_strided_slice %360 {offsets = [0, 0], sizes = [8, 8], strides = [1, 1]} : vector<8x32xf32> to vector<8x8xf32>
    %365 = vector.extract_strided_slice %361 {offsets = [0, 0], sizes = [8, 8], strides = [1, 1]} : vector<8x32xf32> to vector<8x8xf32>
    %cst_119 = arith.constant dense<0.000000e+00> : vector<8x8xf32>
    %366 = tpu.matmul %363, %364, %cst_119 {dimension_numbers = #tpu.dot_dimension_numbers<[1], [1], [0], [0], [0, 0, 1, 0], [], []>} : vector<8x8xf32>, vector<8x8xf32>, vector<8x8xf32> -> vector<8x8xf32>
    %367 = vector.broadcast %362 : vector<1x8xf32> to vector<8x8xf32>
    %368 = arith.addf %366, %367 : vector<8x8xf32>
    %cst_120 = arith.constant dense<0xFF800000> : vector<8xf32>
    %369 = vector.multi_reduction <maximumf>, %368, %cst_120 [1] : vector<8x8xf32> to vector<8xf32>
    %370 = vector.shape_cast %369 : vector<8xf32> to vector<8x1xf32>
    %371 = vector.broadcast %370 : vector<8x1xf32> to vector<8x8xf32>
    %372 = arith.subf %368, %371 : vector<8x8xf32>
    %373 = math.exp %372 : vector<8x8xf32>
    %cst_121 = arith.constant dense<0.000000e+00> : vector<8xf32>
    %374 = vector.multi_reduction <add>, %373, %cst_121 [1] : vector<8x8xf32> to vector<8xf32>
    %375 = vector.shape_cast %374 : vector<8xf32> to vector<8x1xf32>
    %376 = tpu.reciprocal %375 {approx = true} : vector<8x1xf32> -> vector<8x1xf32>
    %377 = vector.broadcast %376 : vector<8x1xf32> to vector<8x8xf32>
    %378 = arith.mulf %373, %377 : vector<8x8xf32>
    %cst_122 = arith.constant dense<0.000000e+00> : vector<8x8xf32>
    %379 = tpu.matmul %378, %365, %cst_122 {dimension_numbers = #tpu.dot_dimension_numbers<[1], [0], [0], [1], [0, 0, 1, 1], [], []>} : vector<8x8xf32>, vector<8x8xf32>, vector<8x8xf32> -> vector<8x8xf32>
    %380 = vector.extract_strided_slice %359 {offsets = [0, 8], sizes = [8, 8], strides = [1, 1]} : vector<8x32xf32> to vector<8x8xf32>
    %381 = vector.extract_strided_slice %360 {offsets = [0, 8], sizes = [8, 8], strides = [1, 1]} : vector<8x32xf32> to vector<8x8xf32>
    %382 = vector.extract_strided_slice %361 {offsets = [0, 8], sizes = [8, 8], strides = [1, 1]} : vector<8x32xf32> to vector<8x8xf32>
    %cst_123 = arith.constant dense<0.000000e+00> : vector<8x8xf32>
    %383 = tpu.matmul %380, %381, %cst_123 {dimension_numbers = #tpu.dot_dimension_numbers<[1], [1], [0], [0], [0, 0, 1, 0], [], []>} : vector<8x8xf32>, vector<8x8xf32>, vector<8x8xf32> -> vector<8x8xf32>
    %384 = vector.broadcast %362 : vector<1x8xf32> to vector<8x8xf32>
    %385 = arith.addf %383, %384 : vector<8x8xf32>
    %cst_124 = arith.constant dense<0xFF800000> : vector<8xf32>
    %386 = vector.multi_reduction <maximumf>, %385, %cst_124 [1] : vector<8x8xf32> to vector<8xf32>
    %387 = vector.shape_cast %386 : vector<8xf32> to vector<8x1xf32>
    %388 = vector.broadcast %387 : vector<8x1xf32> to vector<8x8xf32>
    %389 = arith.subf %385, %388 : vector<8x8xf32>
    %390 = math.exp %389 : vector<8x8xf32>
    %cst_125 = arith.constant dense<0.000000e+00> : vector<8xf32>
    %391 = vector.multi_reduction <add>, %390, %cst_125 [1] : vector<8x8xf32> to vector<8xf32>
    %392 = vector.shape_cast %391 : vector<8xf32> to vector<8x1xf32>
    %393 = tpu.reciprocal %392 {approx = true} : vector<8x1xf32> -> vector<8x1xf32>
    %394 = vector.broadcast %393 : vector<8x1xf32> to vector<8x8xf32>
    %395 = arith.mulf %390, %394 : vector<8x8xf32>
    %cst_126 = arith.constant dense<0.000000e+00> : vector<8x8xf32>
    %396 = tpu.matmul %395, %382, %cst_126 {dimension_numbers = #tpu.dot_dimension_numbers<[1], [0], [0], [1], [0, 0, 1, 1], [], []>} : vector<8x8xf32>, vector<8x8xf32>, vector<8x8xf32> -> vector<8x8xf32>
    %397 = vector.extract_strided_slice %359 {offsets = [0, 16], sizes = [8, 8], strides = [1, 1]} : vector<8x32xf32> to vector<8x8xf32>
    %398 = vector.extract_strided_slice %360 {offsets = [0, 16], sizes = [8, 8], strides = [1, 1]} : vector<8x32xf32> to vector<8x8xf32>
    %399 = vector.extract_strided_slice %361 {offsets = [0, 16], sizes = [8, 8], strides = [1, 1]} : vector<8x32xf32> to vector<8x8xf32>
    %cst_127 = arith.constant dense<0.000000e+00> : vector<8x8xf32>
    %400 = tpu.matmul %397, %398, %cst_127 {dimension_numbers = #tpu.dot_dimension_numbers<[1], [1], [0], [0], [0, 0, 1, 0], [], []>} : vector<8x8xf32>, vector<8x8xf32>, vector<8x8xf32> -> vector<8x8xf32>
    %401 = vector.broadcast %362 : vector<1x8xf32> to vector<8x8xf32>
    %402 = arith.addf %400, %401 : vector<8x8xf32>
    %cst_128 = arith.constant dense<0xFF800000> : vector<8xf32>
    %403 = vector.multi_reduction <maximumf>, %402, %cst_128 [1] : vector<8x8xf32> to vector<8xf32>
    %404 = vector.shape_cast %403 : vector<8xf32> to vector<8x1xf32>
    %405 = vector.broadcast %404 : vector<8x1xf32> to vector<8x8xf32>
    %406 = arith.subf %402, %405 : vector<8x8xf32>
    %407 = math.exp %406 : vector<8x8xf32>
    %cst_129 = arith.constant dense<0.000000e+00> : vector<8xf32>
    %408 = vector.multi_reduction <add>, %407, %cst_129 [1] : vector<8x8xf32> to vector<8xf32>
    %409 = vector.shape_cast %408 : vector<8xf32> to vector<8x1xf32>
    %410 = tpu.reciprocal %409 {approx = true} : vector<8x1xf32> -> vector<8x1xf32>
    %411 = vector.broadcast %410 : vector<8x1xf32> to vector<8x8xf32>
    %412 = arith.mulf %407, %411 : vector<8x8xf32>
    %cst_130 = arith.constant dense<0.000000e+00> : vector<8x8xf32>
    %413 = tpu.matmul %412, %399, %cst_130 {dimension_numbers = #tpu.dot_dimension_numbers<[1], [0], [0], [1], [0, 0, 1, 1], [], []>} : vector<8x8xf32>, vector<8x8xf32>, vector<8x8xf32> -> vector<8x8xf32>
    %414 = vector.extract_strided_slice %359 {offsets = [0, 24], sizes = [8, 8], strides = [1, 1]} : vector<8x32xf32> to vector<8x8xf32>
    %415 = vector.extract_strided_slice %360 {offsets = [0, 24], sizes = [8, 8], strides = [1, 1]} : vector<8x32xf32> to vector<8x8xf32>
    %416 = vector.extract_strided_slice %361 {offsets = [0, 24], sizes = [8, 8], strides = [1, 1]} : vector<8x32xf32> to vector<8x8xf32>
    %cst_131 = arith.constant dense<0.000000e+00> : vector<8x8xf32>
    %417 = tpu.matmul %414, %415, %cst_131 {dimension_numbers = #tpu.dot_dimension_numbers<[1], [1], [0], [0], [0, 0, 1, 0], [], []>} : vector<8x8xf32>, vector<8x8xf32>, vector<8x8xf32> -> vector<8x8xf32>
    %418 = vector.broadcast %362 : vector<1x8xf32> to vector<8x8xf32>
    %419 = arith.addf %417, %418 : vector<8x8xf32>
    %cst_132 = arith.constant dense<0xFF800000> : vector<8xf32>
    %420 = vector.multi_reduction <maximumf>, %419, %cst_132 [1] : vector<8x8xf32> to vector<8xf32>
    %421 = vector.shape_cast %420 : vector<8xf32> to vector<8x1xf32>
    %422 = vector.broadcast %421 : vector<8x1xf32> to vector<8x8xf32>
    %423 = arith.subf %419, %422 : vector<8x8xf32>
    %424 = math.exp %423 : vector<8x8xf32>
    %cst_133 = arith.constant dense<0.000000e+00> : vector<8xf32>
    %425 = vector.multi_reduction <add>, %424, %cst_133 [1] : vector<8x8xf32> to vector<8xf32>
    %426 = vector.shape_cast %425 : vector<8xf32> to vector<8x1xf32>
    %427 = tpu.reciprocal %426 {approx = true} : vector<8x1xf32> -> vector<8x1xf32>
    %428 = vector.broadcast %427 : vector<8x1xf32> to vector<8x8xf32>
    %429 = arith.mulf %424, %428 : vector<8x8xf32>
    %cst_134 = arith.constant dense<0.000000e+00> : vector<8x8xf32>
    %430 = tpu.matmul %429, %416, %cst_134 {dimension_numbers = #tpu.dot_dimension_numbers<[1], [0], [0], [1], [0, 0, 1, 1], [], []>} : vector<8x8xf32>, vector<8x8xf32>, vector<8x8xf32> -> vector<8x8xf32>
    %431 = tpu.concatenate %379, %396, %413, %430 in 1 : vector<8x8xf32>, vector<8x8xf32>, vector<8x8xf32>, vector<8x8xf32> -> vector<8x32xf32>
    %432 = tpu.concatenate %358, %431 in 0 : vector<8x32xf32>, vector<8x32xf32> -> vector<16x32xf32>
    %433 = arith.truncf %432 : vector<16x32xf32> to vector<16x32xbf16>
    %c1_135 = arith.constant 1 : index
    %c0_136 = arith.constant 0 : index
    %c0_137 = arith.constant 0 : index
    %434 = vector.load %arg7[%c1_135, %c0_136, %c0_137] : memref<2x32x32xbf16, #tpu.memory_space<vmem>>, vector<1x32x32xbf16>
    %435 = vector.shape_cast %434 : vector<1x32x32xbf16> to vector<32x32xbf16>
    %cst_138 = arith.constant dense<0.000000e+00> : vector<16x32xf32>
    %436 = tpu.matmul %433, %435, %cst_138 {dimension_numbers = #tpu.dot_dimension_numbers<[1], [0], [0], [1], [0, 0, 1, 1], [], []>} : vector<16x32xbf16>, vector<32x32xbf16>, vector<16x32xf32> -> vector<16x32xf32>
    %c1_139 = arith.constant 1 : index
    %c0_140 = arith.constant 0 : index
    %c0_141 = arith.constant 0 : index
    %437 = vector.load %arg8[%c1_139, %c0_140, %c0_141] : memref<2x1x32xf32, #tpu.memory_space<vmem>>, vector<1x1x32xf32>
    %438 = vector.shape_cast %437 : vector<1x1x32xf32> to vector<1x32xf32>
    %439 = vector.broadcast %438 : vector<1x32xf32> to vector<16x32xf32>
    %440 = arith.addf %436, %439 : vector<16x32xf32>
    %441 = arith.addf %440, %277 : vector<16x32xf32>
    %c1_142 = arith.constant 1 : index
    %c0_143 = arith.constant 0 : index
    %c0_144 = arith.constant 0 : index
    %442 = vector.load %arg9[%c1_142, %c0_143, %c0_144] : memref<2x1x32xf32, #tpu.memory_space<vmem>>, vector<1x1x32xf32>
    %443 = vector.shape_cast %442 : vector<1x1x32xf32> to vector<1x32xf32>
    %c1_145 = arith.constant 1 : index
    %c0_146 = arith.constant 0 : index
    %c0_147 = arith.constant 0 : index
    %444 = vector.load %arg10[%c1_145, %c0_146, %c0_147] : memref<2x1x32xf32, #tpu.memory_space<vmem>>, vector<1x1x32xf32>
    %445 = vector.shape_cast %444 : vector<1x1x32xf32> to vector<1x32xf32>
    %cst_148 = arith.constant dense<0.000000e+00> : vector<16xf32>
    %446 = vector.multi_reduction <add>, %441, %cst_148 [1] : vector<16x32xf32> to vector<16xf32>
    %447 = vector.shape_cast %446 : vector<16xf32> to vector<16x1xf32>
    %cst_149 = arith.constant 3.200000e+01 : f32
    %448 = vector.broadcast %cst_149 : f32 to vector<16x1xf32>
    %449 = arith.divf %447, %448 : vector<16x1xf32>
    %450 = vector.broadcast %449 : vector<16x1xf32> to vector<16x32xf32>
    %451 = arith.subf %441, %450 : vector<16x32xf32>
    %452 = vector.broadcast %449 : vector<16x1xf32> to vector<16x32xf32>
    %453 = arith.subf %441, %452 : vector<16x32xf32>
    %454 = arith.mulf %451, %453 : vector<16x32xf32>
    %cst_150 = arith.constant dense<0.000000e+00> : vector<16xf32>
    %455 = vector.multi_reduction <add>, %454, %cst_150 [1] : vector<16x32xf32> to vector<16xf32>
    %456 = vector.shape_cast %455 : vector<16xf32> to vector<16x1xf32>
    %cst_151 = arith.constant 3.200000e+01 : f32
    %457 = vector.broadcast %cst_151 : f32 to vector<16x1xf32>
    %458 = arith.divf %456, %457 : vector<16x1xf32>
    %459 = vector.broadcast %449 : vector<16x1xf32> to vector<16x32xf32>
    %460 = arith.subf %441, %459 : vector<16x32xf32>
    %cst_152 = arith.constant 9.99999996E-13 : f32
    %461 = vector.broadcast %cst_152 : f32 to vector<16x1xf32>
    %462 = arith.addf %458, %461 : vector<16x1xf32>
    %463 = math.rsqrt %462 : vector<16x1xf32>
    %464 = vector.broadcast %463 : vector<16x1xf32> to vector<16x32xf32>
    %465 = arith.mulf %460, %464 : vector<16x32xf32>
    %466 = vector.broadcast %443 : vector<1x32xf32> to vector<16x32xf32>
    %467 = arith.mulf %465, %466 : vector<16x32xf32>
    %468 = vector.broadcast %445 : vector<1x32xf32> to vector<16x32xf32>
    %469 = arith.addf %467, %468 : vector<16x32xf32>
    %470 = arith.truncf %469 : vector<16x32xf32> to vector<16x32xbf16>
    %c1_153 = arith.constant 1 : index
    %c0_154 = arith.constant 0 : index
    %c0_155 = arith.constant 0 : index
    %471 = vector.load %arg11[%c1_153, %c0_154, %c0_155] : memref<2x32x64xbf16, #tpu.memory_space<vmem>>, vector<1x32x64xbf16>
    %472 = vector.shape_cast %471 : vector<1x32x64xbf16> to vector<32x64xbf16>
    %cst_156 = arith.constant dense<0.000000e+00> : vector<16x64xf32>
    %473 = tpu.matmul %470, %472, %cst_156 {dimension_numbers = #tpu.dot_dimension_numbers<[1], [0], [0], [1], [0, 0, 1, 1], [], []>} : vector<16x32xbf16>, vector<32x64xbf16>, vector<16x64xf32> -> vector<16x64xf32>
    %c1_157 = arith.constant 1 : index
    %c0_158 = arith.constant 0 : index
    %c0_159 = arith.constant 0 : index
    %474 = vector.load %arg12[%c1_157, %c0_158, %c0_159] : memref<2x1x64xf32, #tpu.memory_space<vmem>>, vector<1x1x64xf32>
    %475 = vector.shape_cast %474 : vector<1x1x64xf32> to vector<1x64xf32>
    %476 = vector.broadcast %475 : vector<1x64xf32> to vector<16x64xf32>
    %477 = arith.addf %473, %476 : vector<16x64xf32>
    %cst_160 = arith.constant 5.000000e-01 : f32
    %478 = vector.broadcast %cst_160 : f32 to vector<16x64xf32>
    %479 = arith.mulf %478, %477 : vector<16x64xf32>
    %cst_161 = arith.constant 4.471500e-02 : f32
    %480 = vector.broadcast %cst_161 : f32 to vector<16x64xf32>
    %481 = arith.mulf %480, %477 : vector<16x64xf32>
    %482 = arith.mulf %481, %477 : vector<16x64xf32>
    %483 = arith.mulf %482, %477 : vector<16x64xf32>
    %484 = arith.addf %477, %483 : vector<16x64xf32>
    %cst_162 = arith.constant 0.797884583 : f32
    %485 = vector.broadcast %cst_162 : f32 to vector<16x64xf32>
    %486 = arith.mulf %485, %484 : vector<16x64xf32>
    %487 = math.tanh %486 : vector<16x64xf32>
    %cst_163 = arith.constant 1.000000e+00 : f32
    %488 = vector.broadcast %cst_163 : f32 to vector<16x64xf32>
    %489 = arith.addf %488, %487 : vector<16x64xf32>
    %490 = arith.mulf %479, %489 : vector<16x64xf32>
    %491 = arith.truncf %490 : vector<16x64xf32> to vector<16x64xbf16>
    %c1_164 = arith.constant 1 : index
    %c0_165 = arith.constant 0 : index
    %c0_166 = arith.constant 0 : index
    %492 = vector.load %arg13[%c1_164, %c0_165, %c0_166] : memref<2x64x32xbf16, #tpu.memory_space<vmem>>, vector<1x64x32xbf16>
    %493 = vector.shape_cast %492 : vector<1x64x32xbf16> to vector<64x32xbf16>
    %cst_167 = arith.constant dense<0.000000e+00> : vector<16x32xf32>
    %494 = tpu.matmul %491, %493, %cst_167 {dimension_numbers = #tpu.dot_dimension_numbers<[1], [0], [0], [1], [0, 0, 1, 1], [], []>} : vector<16x64xbf16>, vector<64x32xbf16>, vector<16x32xf32> -> vector<16x32xf32>
    %c1_168 = arith.constant 1 : index
    %c0_169 = arith.constant 0 : index
    %c0_170 = arith.constant 0 : index
    %495 = vector.load %arg14[%c1_168, %c0_169, %c0_170] : memref<2x1x32xf32, #tpu.memory_space<vmem>>, vector<1x1x32xf32>
    %496 = vector.shape_cast %495 : vector<1x1x32xf32> to vector<1x32xf32>
    %497 = vector.broadcast %496 : vector<1x32xf32> to vector<16x32xf32>
    %498 = arith.addf %494, %497 : vector<16x32xf32>
    %499 = arith.addf %498, %469 : vector<16x32xf32>
    %c1_171 = arith.constant 1 : index
    %c0_172 = arith.constant 0 : index
    %c0_173 = arith.constant 0 : index
    %500 = vector.load %arg15[%c1_171, %c0_172, %c0_173] : memref<2x1x32xf32, #tpu.memory_space<vmem>>, vector<1x1x32xf32>
    %501 = vector.shape_cast %500 : vector<1x1x32xf32> to vector<1x32xf32>
    %c1_174 = arith.constant 1 : index
    %c0_175 = arith.constant 0 : index
    %c0_176 = arith.constant 0 : index
    %502 = vector.load %arg16[%c1_174, %c0_175, %c0_176] : memref<2x1x32xf32, #tpu.memory_space<vmem>>, vector<1x1x32xf32>
    %503 = vector.shape_cast %502 : vector<1x1x32xf32> to vector<1x32xf32>
    %cst_177 = arith.constant dense<0.000000e+00> : vector<16xf32>
    %504 = vector.multi_reduction <add>, %499, %cst_177 [1] : vector<16x32xf32> to vector<16xf32>
    %505 = vector.shape_cast %504 : vector<16xf32> to vector<16x1xf32>
    %cst_178 = arith.constant 3.200000e+01 : f32
    %506 = vector.broadcast %cst_178 : f32 to vector<16x1xf32>
    %507 = arith.divf %505, %506 : vector<16x1xf32>
    %508 = vector.broadcast %507 : vector<16x1xf32> to vector<16x32xf32>
    %509 = arith.subf %499, %508 : vector<16x32xf32>
    %510 = vector.broadcast %507 : vector<16x1xf32> to vector<16x32xf32>
    %511 = arith.subf %499, %510 : vector<16x32xf32>
    %512 = arith.mulf %509, %511 : vector<16x32xf32>
    %cst_179 = arith.constant dense<0.000000e+00> : vector<16xf32>
    %513 = vector.multi_reduction <add>, %512, %cst_179 [1] : vector<16x32xf32> to vector<16xf32>
    %514 = vector.shape_cast %513 : vector<16xf32> to vector<16x1xf32>
    %cst_180 = arith.constant 3.200000e+01 : f32
    %515 = vector.broadcast %cst_180 : f32 to vector<16x1xf32>
    %516 = arith.divf %514, %515 : vector<16x1xf32>
    %517 = vector.broadcast %507 : vector<16x1xf32> to vector<16x32xf32>
    %518 = arith.subf %499, %517 : vector<16x32xf32>
    %cst_181 = arith.constant 9.99999996E-13 : f32
    %519 = vector.broadcast %cst_181 : f32 to vector<16x1xf32>
    %520 = arith.addf %516, %519 : vector<16x1xf32>
    %521 = math.rsqrt %520 : vector<16x1xf32>
    %522 = vector.broadcast %521 : vector<16x1xf32> to vector<16x32xf32>
    %523 = arith.mulf %518, %522 : vector<16x32xf32>
    %524 = vector.broadcast %501 : vector<1x32xf32> to vector<16x32xf32>
    %525 = arith.mulf %523, %524 : vector<16x32xf32>
    %526 = vector.broadcast %503 : vector<1x32xf32> to vector<16x32xf32>
    %527 = arith.addf %525, %526 : vector<16x32xf32>
    %528 = vector.extract_strided_slice %527 {offsets = [0, 0], sizes = [1, 32], strides = [1, 1]} : vector<16x32xf32> to vector<1x32xf32>
    %529 = vector.extract_strided_slice %527 {offsets = [8, 0], sizes = [1, 32], strides = [1, 1]} : vector<16x32xf32> to vector<1x32xf32>
    %530 = tpu.concatenate %528, %529 in 0 : vector<1x32xf32>, vector<1x32xf32> -> vector<2x32xf32>
    %c0_182 = arith.constant 0 : index
    %c0_183 = arith.constant 0 : index
    %531 = vector.load %arg17[%c0_182, %c0_183] : memref<2x32xf32, #tpu.memory_space<vmem>>, vector<2x32xf32>
    tpu.vector_store %arg17[%c0_182, %c0_183], %530 {strides = array<i32>} : memref<2x32xf32, #tpu.memory_space<vmem>>, vector<2x32xf32>,
    return
  }
  func.func @transform_0(%arg0: i32) -> (i32, i32) {
    %c0_i32 = arith.constant 0 : i32
    %c0_i32_0 = arith.constant 0 : i32
    %c0_i32_1 = arith.constant 0 : i32
    return %c0_i32, %c0_i32_0 : i32, i32
  }
  func.func @transform_1(%arg0: i32) -> (i32, i32) {
    %c0_i32 = arith.constant 0 : i32
    %c0_i32_0 = arith.constant 0 : i32
    %c0_i32_1 = arith.constant 0 : i32
    return %c0_i32, %c0_i32_0 : i32, i32
  }
  func.func @transform_2(%arg0: i32) -> (i32, i32) {
    %c0_i32 = arith.constant 0 : i32
    %c0_i32_0 = arith.constant 0 : i32
    %c0_i32_1 = arith.constant 0 : i32
    return %c0_i32, %c0_i32_0 : i32, i32
  }
  func.func @transform_3(%arg0: i32) -> (i32, i32) {
    %c0_i32 = arith.constant 0 : i32
    %c0_i32_0 = arith.constant 0 : i32
    %c0_i32_1 = arith.constant 0 : i32
    return %c0_i32, %c0_i32_0 : i32, i32
  }
  func.func @transform_4(%arg0: i32) -> (i32, i32, i32) {
    %c0_i32 = arith.constant 0 : i32
    %c0_i32_0 = arith.constant 0 : i32
    %c0_i32_1 = arith.constant 0 : i32
    %c0_i32_2 = arith.constant 0 : i32
    return %c0_i32, %c0_i32_0, %c0_i32_1 : i32, i32, i32
  }
  func.func @transform_5(%arg0: i32) -> (i32, i32, i32) {
    %c0_i32 = arith.constant 0 : i32
    %c0_i32_0 = arith.constant 0 : i32
    %c0_i32_1 = arith.constant 0 : i32
    %c0_i32_2 = arith.constant 0 : i32
    return %c0_i32, %c0_i32_0, %c0_i32_1 : i32, i32, i32
  }
  func.func @transform_6(%arg0: i32) -> (i32, i32, i32) {
    %c0_i32 = arith.constant 0 : i32
    %c0_i32_0 = arith.constant 0 : i32
    %c0_i32_1 = arith.constant 0 : i32
    %c0_i32_2 = arith.constant 0 : i32
    return %c0_i32, %c0_i32_0, %c0_i32_1 : i32, i32, i32
  }
  func.func @transform_7(%arg0: i32) -> (i32, i32, i32) {
    %c0_i32 = arith.constant 0 : i32
    %c0_i32_0 = arith.constant 0 : i32
    %c0_i32_1 = arith.constant 0 : i32
    %c0_i32_2 = arith.constant 0 : i32
    return %c0_i32, %c0_i32_0, %c0_i32_1 : i32, i32, i32
  }
  func.func @transform_8(%arg0: i32) -> (i32, i32, i32) {
    %c0_i32 = arith.constant 0 : i32
    %c0_i32_0 = arith.constant 0 : i32
    %c0_i32_1 = arith.constant 0 : i32
    %c0_i32_2 = arith.constant 0 : i32
    return %c0_i32, %c0_i32_0, %c0_i32_1 : i32, i32, i32
  }
  func.func @transform_9(%arg0: i32) -> (i32, i32, i32) {
    %c0_i32 = arith.constant 0 : i32
    %c0_i32_0 = arith.constant 0 : i32
    %c0_i32_1 = arith.constant 0 : i32
    %c0_i32_2 = arith.constant 0 : i32
    return %c0_i32, %c0_i32_0, %c0_i32_1 : i32, i32, i32
  }
  func.func @transform_10(%arg0: i32) -> (i32, i32, i32) {
    %c0_i32 = arith.constant 0 : i32
    %c0_i32_0 = arith.constant 0 : i32
    %c0_i32_1 = arith.constant 0 : i32
    %c0_i32_2 = arith.constant 0 : i32
    return %c0_i32, %c0_i32_0, %c0_i32_1 : i32, i32, i32
  }
  func.func @transform_11(%arg0: i32) -> (i32, i32, i32) {
    %c0_i32 = arith.constant 0 : i32
    %c0_i32_0 = arith.constant 0 : i32
    %c0_i32_1 = arith.constant 0 : i32
    %c0_i32_2 = arith.constant 0 : i32
    return %c0_i32, %c0_i32_0, %c0_i32_1 : i32, i32, i32
  }
  func.func @transform_12(%arg0: i32) -> (i32, i32, i32) {
    %c0_i32 = arith.constant 0 : i32
    %c0_i32_0 = arith.constant 0 : i32
    %c0_i32_1 = arith.constant 0 : i32
    %c0_i32_2 = arith.constant 0 : i32
    return %c0_i32, %c0_i32_0, %c0_i32_1 : i32, i32, i32
  }
  func.func @transform_13(%arg0: i32) -> (i32, i32, i32) {
    %c0_i32 = arith.constant 0 : i32
    %c0_i32_0 = arith.constant 0 : i32
    %c0_i32_1 = arith.constant 0 : i32
    %c0_i32_2 = arith.constant 0 : i32
    return %c0_i32, %c0_i32_0, %c0_i32_1 : i32, i32, i32
  }
  func.func @transform_14(%arg0: i32) -> (i32, i32, i32) {
    %c0_i32 = arith.constant 0 : i32
    %c0_i32_0 = arith.constant 0 : i32
    %c0_i32_1 = arith.constant 0 : i32
    %c0_i32_2 = arith.constant 0 : i32
    return %c0_i32, %c0_i32_0, %c0_i32_1 : i32, i32, i32
  }
  func.func @transform_15(%arg0: i32) -> (i32, i32, i32) {
    %c0_i32 = arith.constant 0 : i32
    %c0_i32_0 = arith.constant 0 : i32
    %c0_i32_1 = arith.constant 0 : i32
    %c0_i32_2 = arith.constant 0 : i32
    return %c0_i32, %c0_i32_0, %c0_i32_1 : i32, i32, i32
  }
  func.func @transform_16(%arg0: i32) -> (i32, i32) {
    %c0_i32 = arith.constant 0 : i32
    %c0_i32_0 = arith.constant 0 : i32
    %c0_i32_1 = arith.constant 0 : i32
    return %c0_i32, %c0_i32_0 : i32, i32
  }
}

</mosaic_0001>

<bundles_post_ra>
// kernel: tpu_custom_call.1
= control target key start
LH: loop header
LB: loop body
LE: loop exit
PB: predicated region body
PF: predicated region fallthrough
CT: control target
= control target key end

     0   :  { %s2973_s0 = inlined_call_operand.hbm [shape: f32[16,32], index: 0, kind: input, shape index: {}]   ;;  %s2974_s1 = inlined_call_operand.hbm [shape: f32[2,8], index: 1, kind: input, shape index: {}]   ;;  %s2975_s2 = inlined_call_operand.vmem [shape: f32[1,32], index: 2, kind: input, shape index: {}]   ;;  %s2976_s3 = inlined_call_operand.hbm [shape: f32[1,32], index: 3, kind: input, shape index: {}]   ;;  %s2977_s4 = inlined_call_operand.vmem [shape: bf16[2,32,96], index: 4, kind: input, shape index: {}]   ;;  %s2978_s5 = inlined_call_operand.vmem [shape: f32[2,1,96], index: 5, kind: input, shape index: {}]   ;;  %s2979_s6 = inlined_call_operand.vmem [shape: bf16[2,32,32], index: 6, kind: input, shape index: {}]   ;;  %s2980_s7 = inlined_call_operand.vmem [shape: f32[2,1,32], index: 7, kind: input, shape index: {}]   ;;  %s2981_s8 = inlined_call_operand.vmem [shape: f32[2,1,32], index: 8, kind: input, shape index: {}]   ;;  %s2982_s9 = inlined_call_operand.hbm [shape: f32[2,1,32], index: 9, kind: input, shape index: {}]   ;;  %s2983_s10 = inlined_call_operand.vmem [shape: bf16[2,32,64], index: 10, kind: input, shape index: {}]   ;;  %s2984_s11 = inlined_call_operand.vmem [shape: f32[2,1,64], index: 11, kind: input, shape index: {}]   ;;  %s2985_s12 = inlined_call_operand.vmem [shape: bf16[2,64,32], index: 12, kind: input, shape index: {}]   ;;  %s2986_s13 = inlined_call_operand.vmem [shape: f32[2,1,32], index: 13, kind: input, shape index: {}]   ;;  %s2987_s14 = inlined_call_operand.vmem [shape: f32[2,1,32], index: 14, kind: input, shape index: {}]   ;;  %s2988_s15 = inlined_call_operand.hbm [shape: f32[2,1,32], index: 15, kind: input, shape index: {}]   ;;  %s2989_s16 = inlined_call_operand.hbm [shape: f32[2,32], index: 16, kind: output, shape index: {}]  }
   0x1   :  { %2995 = sst [smem:[#allocation16_spill]] %s2973_s0 }
   0x2   :  { %21 = vsyncpa [#allocation3], 0 }
   0x3   :  { %22 = vsyncpa [#allocation6], 0 }
   0x4   :  { %23 = vsyncpa [#allocation9], 0  ;;  %s43_s23 = sshll.u32 %s2974_s1, 4  ;;  %s44_s23 = int_to_ptr.hbm [resolvable:$true] %s43_s23 }
   0x5   :  { %24 = vsyncpa [#allocation4], 0  ;;  %s2439_s24 = smov [#allocation5]   ;;  %s76_s28 = sshll.u32 %s2982_s9, 4  ;;  %s77_s28 = int_to_ptr.hbm [resolvable:$true] %s76_s28 }
   0x6   :  { %s45_s25 = sshll.u32 %s2439_s24, 4  ;;  %s2440_s29 = smov [#allocation8]   ;;  %s46_s25 = int_to_ptr.vmem [resolvable:$true] %s45_s25 }
   0x7   :  { %48 = dma.hbm_to_vmem [thread:$0]  %s44_s23, 32, %s46_s25, [#allocation6]  }
   0x8   :  { %s78_s30 = sshll.u32 %s2440_s29, 4  ;;  %s2991_s0 = smov 16   ;;  %s79_s30 = int_to_ptr.vmem [resolvable:$true] %s78_s30 }
   0x9   :  { %s2442_s17 = smov 1   ;;  %s2996_s19 = sld [smem:[#allocation16_spill]] }
   0xa   :  { %84 = dma.hbm_to_vmem [thread:$0]  %s77_s28, 32, %s79_s30, [#allocation9], %s2991_s0, %s2991_s0, %s2442_s17  }
   0xb   :  { %s2443_s21 = smov [#allocation2]   ;;  %s56_s23 = sshll.u32 %s2976_s3, 4  ;;  %s57_s23 = int_to_ptr.hbm [resolvable:$true] %s56_s23 }
   0xc   :  { %s31_s22 = sshll.u32 %s2443_s21, 4  ;;  %s2444_s25 = smov 128   ;;  %s32_s22 = int_to_ptr.vmem [resolvable:$true] %s31_s22 }
   0xd   :  { %s2992_s26 = smov 8   ;;  %s2446_s27 = smov [#allocation7]  }
   0xe   :  { %s58_s29 = sshll.u32 %s2446_s27, 4  ;;  %s99_s1 = sshll.u32 %s2988_s15, 4  ;;  %s59_s29 = int_to_ptr.vmem [resolvable:$true] %s58_s29  ;;  %s100_s1 = int_to_ptr.hbm [resolvable:$true] %s99_s1 }
   0xf   :  { %s29_s20 = sshll.u32 %s2996_s19, 4  ;;  %s2447_s18 = smov [#allocation10]   ;;  %s30_s20 = int_to_ptr.hbm [resolvable:$true] %s29_s20 }
  0x10   :  { %37 = dma.hbm_to_vmem [thread:$0]  %s30_s20, 256, %s32_s22, [#allocation3], %s2444_s25, %s2444_s25, %s2992_s26  }
  0x11   :  { %61 = dma.hbm_to_vmem [thread:$0]  %s57_s23, 16, %s59_s29, [#allocation6]  }
  0x12   :  { %s101_s19 = sshll.u32 %s2447_s18, 4  ;;  %s102_s19 = int_to_ptr.vmem [resolvable:$true] %s101_s19 }
  0x13   :  { %107 = dma.hbm_to_vmem [thread:$0]  %s100_s1, 32, %s102_s19, [#allocation9], %s2991_s0, %s2991_s0, %s2442_s17  }
  0x14   :  { %2431 = dma.done.wait [#allocation3], 256  }
  0x15   :  { %2432 = vsyncadd [#allocation3], 4294967040 }
  0x16   :  { %2433 = dma.done.wait [#allocation6], 48  }
  0x17   :  { %2434 = vsyncadd [#allocation6], 4294967248 }
  0x18   :  { %2435 = dma.done.wait [#allocation9], 64  }
  0x19   :  { %2436 = vsyncadd [#allocation9], 4294967232  ;;  %vm133_vm0 = vcmask 261120   ;;  %v129_v0 = vld [vmem:[#allocation2] sm:$0xff]  ;;  %v130_v2 = vld [vmem:[#allocation2 + $0x8] sm:$0xff]  ;;  %v2448_v4 = vmov 32.0  }
  0x1a   :  { %v134_v1 = vsel %vm133_vm0, %v129_v0, 0.0  ;;  %v137_v3 = vsel %vm133_vm0, %v130_v2, 0.0  ;;  %2193 = vrcp.f32 %v2448_v4  ;;  %v2103_v21 = vld [vmem:[%s2977_s4 + $0x8] sm:$0xff]  ;;  %v2102_v23 = vld [vmem:[%s2977_s4] sm:$0xff]  ;;  %v2176_v47 = vld [vmem:[#allocation7] ss:$0 sm:$0xff] }
  0x1b   :  { %135 = vadd.xlane.f32.xlu0 %v134_v1  ;;  %226 = vmatpush.bf16.msra.mxu0 %v2103_v21  ;;  %v2175_v42 = vld [vmem:[%s2975_s2] ss:$0 sm:$0xff]  ;;  %s2449_s2 = smov 80   ;;  %s2450_s23 = smov 120   ;;  %vm238_vm8 = vcmask 64512   ;;  %vm508_vm9 = vcmask 130048  }
  0x1c   :  { %v2177_v52 = vld [vmem:[%s2978_s5] ss:$0 sm:$0xff]  ;;  %s2451_s25 = smov 96   ;;  %s2452_s27 = smov 88   ;;  %v2615_v60 = vld [vmem:[#allocation5] sm:$0x3] }
  0x1d   :  { %s2453_s29 = smov 112   ;;  %v2618_v61 = vperm.slane %v2615_v60, 0  ;;  %s2454_s28 = smov 72   ;;  %vm510_vm10 = vcmask 195584  }
  0x1e   :  { %s2455_s30 = smov 64   ;;  %s2456_s1 = smov 56  }
  0x1f   :  { %227 = vmatpush.bf16.msra.mxu0 %v2102_v23  ;;  %s2993_s18 = smov 48   ;;  %s2458_s19 = smov 104  }
  0x20   :  { %v2194_v5 = vpop.eup %2193  ;;  %s2459_s3 = smov 40   ;;  %s2990_s15 = smov 24  }
  0x21   :  { %v141_v6 = vmul.f32 32.0, %v2194_v5  ;;  %vm145_vm1 = vweird.f32 %v2194_v5 }
  0x23   :  { %138 = vadd.xlane.f32.xlu0 %v137_v3  ;;  %v142_v7 = vsub.f32 1.0, %v141_v6 }
  0x25   :  { %v143_v8 = vmul.f32 %v2194_v5, %v142_v7 }
  0x27   :  { %v144_v9 = vadd.f32 %v2194_v5, %v143_v8 }
  0x29   :  { %v2569_v10 = vsel %vm145_vm1, %v2194_v5, %v144_v9 }
  0x8e   :  { %v136_v11 = vpop.xlane.xlu0 %135 }
  0x8f   :  { %v147_v12 = vmul.f32 %v2569_v10, %v136_v11 }
  0x91   :  { %v149_v13 = vsub.f32 %v129_v0, %v147_v12 }
  0x93   :  { %v151_v14 = vmul.f32 %v149_v13, %v149_v13 }
  0x95   :  { %v153_v15 = vsel %vm133_vm0, %v151_v14, 0.0 }
  0x96   :  { %154 = vadd.xlane.f32.xlu1 %v153_v15  ;;  %v139_v16 = vpop.xlane.xlu0 %138 }
  0x97   :  { %v148_v17 = vmul.f32 %v2569_v10, %v139_v16 }
  0x99   :  { %v150_v18 = vsub.f32 %v130_v2, %v148_v17 }
  0x9b   :  { %v152_v19 = vmul.f32 %v150_v18, %v150_v18 }
  0x9d   :  { %v156_v20 = vsel %vm133_vm0, %v152_v19, 0.0 }
  0x9e   :  { %157 = vadd.xlane.f32.xlu1 %v156_v20 }
 0x109   :  { %v155_v22 = vpop.xlane.xlu1 %154 }
 0x10a   :  { %v159_v24 = vmul.f32 %v155_v22, %v2569_v10 }
 0x10c   :  { %v161_v25 = vadd.f32 1e-12, %v159_v24 }
 0x10e   :  { %2195 = vrsqrt.f32 %v161_v25  ;;  %vm169_vm3 = vweird.f32 %v161_v25 }
 0x111   :  { %v158_v26 = vpop.xlane.xlu1 %157 }
 0x112   :  { %v160_v27 = vmul.f32 %v158_v26, %v2569_v10 }
 0x114   :  { %v2196_v28 = vpop.eup %2195  ;;  %v162_v29 = vadd.f32 1e-12, %v160_v27 }
 0x115   :  { %v164_v30 = vmul.f32 %v2196_v28, %v161_v25  ;;  %vm170_vm2 = vweird.f32 %v2196_v28 }
 0x116   :  { %2197 = vrsqrt.f32 %v162_v29  ;;  %vm171_vm4 = vmor %vm169_vm3, %vm170_vm2  ;;  %vm179_vm6 = vweird.f32 %v162_v29  ;;  %vm976_vm2 = vcmask 523264  }
 0x117   :  { %v165_v31 = vmul.f32 %v2196_v28, %v164_v30 }
 0x119   :  { %v166_v32 = vmul.f32 0.5, %v165_v31 }
 0x11b   :  { %v167_v33 = vsub.f32 1.5, %v166_v32 }
 0x11c   :  { %v2198_v34 = vpop.eup %2197 }
 0x11d   :  { %v168_v35 = vmul.f32 %v2196_v28, %v167_v33  ;;  %v174_v36 = vmul.f32 %v2198_v34, %v162_v29  ;;  %vm180_vm5 = vweird.f32 %v2198_v34 }
 0x11e   :  { %vm181_vm7 = vmor %vm179_vm6, %vm180_vm5 }
 0x11f   :  { %v175_v37 = vmul.f32 %v2198_v34, %v174_v36  ;;  %v172_v38 = vsel %vm171_vm4, %v2196_v28, %v168_v35 }
 0x120   :  { %v183_v41 = vmul.f32 %v172_v38, %v149_v13 }
 0x121   :  { %v176_v39 = vmul.f32 0.5, %v175_v37 }
 0x122   :  { %v188_v46 = vmul.f32 %v2175_v42, %v183_v41 }
 0x123   :  { %v177_v40 = vsub.f32 1.5, %v176_v39 }
 0x124   :  { %v2586_v49 = vadd.f32 %v2176_v47, %v188_v46 }
 0x125   :  { %v178_v43 = vmul.f32 %v2198_v34, %v177_v40 }
 0x127   :  { %v182_v44 = vsel %vm181_vm7, %v2198_v34, %v178_v43 }
 0x128   :  { %v184_v45 = vmul.f32 %v182_v44, %v150_v18 }
 0x12a   :  { %v189_v48 = vmul.f32 %v2175_v42, %v184_v45 }
 0x12c   :  { %v2588_v50 = vadd.f32 %v2176_v47, %v189_v48  ;;  %v2672_v47 = vperm.slane %v2615_v60, 1 }
 0x12e   :  { %v196_v51 = vpack.c.bf16 %v2588_v50, %v2586_v49 }
 0x130   :  { %1948 = vmatmul.msk.bf16.vlgmr.msra.gmra.mxu0 %vm133_vm0, %v196_v51 }
 0x1ad   :  { %v229_v53 = vpop.f32.mrf.mxu0 }
 0x1ae   :  { %v2596_v54 = vadd.f32 %v2177_v52, %v229_v53 }
 0x1b0   :  { %367 = vrot.lane.b32.xlu1 %v2596_v54, %s2449_s2  ;;  %300 = vrot.lane.b32.xlu0 %v2596_v54, %s2450_s23 }
 0x1b1   :  { %236 = vrot.lane.b32.xlu2 %v2596_v54, %s2451_s25 }
 0x1b5   :  { %v231_v7 = vpop.f32.mrf.mxu0 }
 0x1b6   :  { %v2628_v8 = vadd.f32 %v2177_v52, %v231_v7 }
 0x1b9   :  { %302 = vrot.lane.b32.xlu2 %v2596_v54, %s2452_s27 }
 0x1c1   :  { %365 = vrot.lane.b32.xlu2 %v2596_v54, %s2453_s29 }
 0x20b   :  { %v237_v55 = vpop.permute.xlu2 %236 }
 0x20c   :  { %1949 = vmatpush.xpose.msk.msra.mxu3 %vm238_vm8, %v237_v55 }
 0x20f   :  { %1950 = vmatmul.msk.f32.vlgmr.msra.gmra.mxu3 %vm238_vm8, %v2596_v54 }
 0x213   :  { %v303_v56 = vpop.permute.xlu2 %302 }
 0x214   :  { %1952 = vmatpush.xpose.msk.msrb.mxu3 %vm238_vm8, %v303_v56 }
 0x21b   :  { %v366_v59 = vpop.permute.xlu2 %365 }
 0x222   :  { %v368_v57 = vpop.permute.xlu1 %367  ;;  %v301_v58 = vpop.permute.xlu0 %300 }
 0x223   :  { %1953 = vmatmul.msk.f32.vlgmr.msrb.gmra.mxu3 %vm238_vm8, %v301_v58  ;;  %1955 = vmatpush.xpose.msk.msra.mxu1 %vm238_vm8, %v368_v57 }
 0x226   :  { %1956 = vmatmul.msk.f32.vlgmr.msra.gmra.mxu1 %vm238_vm8, %v366_v59 }
 0x292   :  { %v260_v62 = vpop.f32.mrf.mxu3 }
 0x293   :  { %v261_v63 = vadd.f32 %v260_v62, %v2618_v61 }
 0x295   :  { %v263_v0 = vsel %vm238_vm8, %v261_v63, -inf }
 0x296   :  { %264 = vmax.xlane.f32.xlu2 %v263_v0 }
 0x2a3   :  { %v390_v1 = vpop.f32.mrf.mxu1 }
 0x2a4   :  { %v391_v2 = vadd.f32 %v390_v1, %v2618_v61 }
 0x2a6   :  { %v325_v3 = vpop.f32.mrf.mxu3  ;;  %v393_v4 = vsel %vm238_vm8, %v391_v2, -inf }
 0x2a7   :  { %v326_v5 = vadd.f32 %v325_v3, %v2618_v61  ;;  %394 = vmax.xlane.f32.xlu1 %v393_v4 }
 0x2a9   :  { %v328_v6 = vsel %vm238_vm8, %v326_v5, -inf }
 0x2aa   :  { %329 = vmax.xlane.f32.xlu0 %v328_v6 }
 0x2ae   :  { %432 = vrot.lane.b32.xlu2 %v2596_v54, %s2454_s28 }
 0x2b6   :  { %579 = vrot.lane.b32.xlu2 %v2628_v8, %s2452_s27 }
 0x2be   :  { %274 = vrot.lane.b32.xlu0 %v2596_v54, %s2455_s30 }
 0x2c0   :  { %339 = vrot.lane.b32.xlu1 %v2596_v54, %s2456_s1 }
 0x2c6   :  { %404 = vrot.lane.b32.xlu0 %v2596_v54, %s2993_s18 }
 0x2c8   :  { %514 = vrot.lane.b32.xlu1 %v2628_v8, %s2451_s25 }
 0x2ce   :  { %430 = vrot.lane.b32.xlu0 %v2596_v54, %s2458_s19 }
 0x2d0   :  { %644 = vrot.lane.b32.xlu1 %v2628_v8, %s2449_s2 }
 0x2d6   :  { %577 = vrot.lane.b32.xlu0 %v2628_v8, %s2450_s23 }
 0x2d8   :  { %707 = vrot.lane.b32.xlu1 %v2628_v8, %s2458_s19 }
 0x2de   :  { %642 = vrot.lane.b32.xlu0 %v2628_v8, %s2453_s29 }
 0x309   :  { %v265_v9 = vpop.xlane.xlu2 %264 }
 0x30a   :  { %v266_v13 = vsub.f32 %v261_v63, %v265_v9 }
 0x30c   :  { %v267_v15 = vmul.f32 1.442695, %v266_v13 }
 0x311   :  { %v433_v29 = vpop.permute.xlu2 %432 }
 0x319   :  { %v580_v30 = vpop.permute.xlu2 %579 }
 0x31a   :  { %v395_v11 = vpop.xlane.xlu1 %394 }
 0x31b   :  { %v396_v12 = vsub.f32 %v391_v2, %v395_v11 }
 0x31d   :  { %v397_v14 = vmul.f32 1.442695, %v396_v12  ;;  %v330_v16 = vpop.xlane.xlu0 %329 }
 0x31e   :  { %v331_v18 = vsub.f32 %v326_v5, %v330_v16 }
 0x31f   :  { %2199 = vpow2.f32 %v397_v14 }
 0x320   :  { %2201 = vpow2.f32 %v267_v15  ;;  %v332_v20 = vmul.f32 1.442695, %v331_v18 }
 0x322   :  { %2203 = vpow2.f32 %v332_v20 }
 0x325   :  { %v2200_v17 = vpop.eup %2199 }
 0x326   :  { %v399_v19 = vsel %vm238_vm8, %v2200_v17, 0.0  ;;  %v2202_v21 = vpop.eup %2201 }
 0x327   :  { %400 = vadd.xlane.f32.xlu2 %v399_v19  ;;  %v269_v22 = vsel %vm238_vm8, %v2202_v21, 0.0 }
 0x328   :  { %v2204_v25 = vpop.eup %2203 }
 0x329   :  { %v334_v26 = vsel %vm238_vm8, %v2204_v25, 0.0 }
 0x32f   :  { %270 = vadd.xlane.f32.xlu2 %v269_v22 }
 0x330   :  { %v275_v23 = vpop.permute.xlu0 %274 }
 0x331   :  { %295 = vmatpush.msra.mxu2 %v275_v23 }
 0x332   :  { %v340_v24 = vpop.permute.xlu1 %339 }
 0x333   :  { %360 = vmatpush.msrb.mxu2 %v340_v24 }
 0x337   :  { %335 = vadd.xlane.f32.xlu2 %v334_v26 }
 0x338   :  { %v405_v27 = vpop.permute.xlu0 %404 }
 0x339   :  { %425 = vmatpush.msra.mxu3 %v405_v27 }
 0x33a   :  { %v515_v28 = vpop.permute.xlu1 %514 }
 0x33b   :  { %1961 = vmatpush.xpose.msk.msrb.mxu3 %vm238_vm8, %v515_v28 }
 0x340   :  { %v431_v32 = vpop.permute.xlu0 %430 }
 0x342   :  { %v645_v36 = vpop.permute.xlu1 %644 }
 0x348   :  { %v578_v38 = vpop.permute.xlu0 %577 }
 0x34a   :  { %v708_v45 = vpop.permute.xlu1 %707 }
 0x34f   :  { %709 = vrot.lane.b32.xlu2 %v2628_v8, %s2454_s28 }
 0x350   :  { %v643_v43 = vpop.permute.xlu0 %642 }
 0x39a   :  { %v401_v31 = vpop.xlane.xlu2 %400 }
 0x39b   :  { %2205 = vrcp.f32 %v401_v31 }
 0x3a1   :  { %v2206_v33 = vpop.eup %2205 }
 0x3a2   :  { %v403_v34 = vmul.f32 %v2206_v33, %v2200_v17  ;;  %v271_v35 = vpop.xlane.xlu2 %270 }
 0x3a3   :  { %2207 = vrcp.f32 %v271_v35 }
 0x3a4   :  { %1957 = vmatmul.msk.f32.vlgmr.msra.gmra.mxu3 %vm238_vm8, %v403_v34 }
 0x3a5   :  { %1967 = vmatpush.xpose.msk.msra.mxu3 %vm238_vm8, %v645_v36 }
 0x3a9   :  { %v2208_v37 = vpop.eup %2207 }
 0x3aa   :  { %v336_v39 = vpop.xlane.xlu2 %335  ;;  %v273_v40 = vmul.f32 %v2208_v37, %v2202_v21 }
 0x3ab   :  { %2209 = vrcp.f32 %v336_v39 }
 0x3ac   :  { %1951 = vmatmul.msk.f32.vlgmr.msra.gmra.mxu2 %vm238_vm8, %v273_v40  ;;  %1962 = vmatmul.msk.f32.vlgmr.msrb.gmra.mxu3 %vm238_vm8, %v2628_v8 }
 0x3ad   :  { %1958 = vmatpush.xpose.msk.msra.mxu2 %vm238_vm8, %v433_v29 }
 0x3b1   :  { %v2210_v41 = vpop.eup %2209 }
 0x3b2   :  { %v338_v42 = vmul.f32 %v2210_v41, %v2204_v25  ;;  %v710_v44 = vpop.permute.xlu2 %709 }
 0x3b4   :  { %1954 = vmatmul.msk.f32.vlgmr.msrb.gmra.mxu2 %vm238_vm8, %v338_v42  ;;  %1968 = vmatmul.msk.f32.vlgmr.msra.gmra.mxu3 %vm238_vm8, %v643_v43 }
 0x3b5   :  { %1964 = vmatpush.xpose.msk.msrb.mxu2 %vm238_vm8, %v580_v30 }
 0x3bc   :  { %1959 = vmatmul.msk.f32.vlgmr.msra.gmra.mxu2 %vm238_vm8, %v431_v32 }
 0x3bd   :  { %1970 = vmatpush.xpose.msk.msra.mxu2 %vm238_vm8, %v710_v44 }
 0x3c4   :  { %1965 = vmatmul.msk.f32.vlgmr.msrb.gmra.mxu2 %vm238_vm8, %v578_v38 }
 0x3cc   :  { %1971 = vmatmul.msk.f32.vlgmr.msra.gmra.mxu2 %vm238_vm8, %v708_v45 }
 0x427   :  { %v2669_v46 = vpop.f32.mrf.mxu3 }
 0x42f   :  { %v2674_v48 = vpop.f32.mrf.mxu2  ;;  %v537_v51 = vpop.f32.mrf.mxu3 }
 0x430   :  { %v538_v52 = vadd.f32 %v537_v51, %v2672_v47 }
 0x432   :  { %v540_v53 = vsel %vm238_vm8, %v538_v52, -inf }
 0x433   :  { %541 = vmax.xlane.f32.xlu0 %v540_v53 }
 0x437   :  { %v2678_v55 = vpop.f32.mrf.mxu2  ;;  %v667_v59 = vpop.f32.mrf.mxu3 }
 0x438   :  { %v668_v60 = vadd.f32 %v667_v59, %v2672_v47 }
 0x43a   :  { %v670_v1 = vsel %vm238_vm8, %v668_v60, -inf }
 0x43f   :  { %v455_v56 = vpop.f32.mrf.mxu2 }
 0x440   :  { %v456_v57 = vadd.f32 %v455_v56, %v2618_v61 }
 0x442   :  { %v458_v58 = vsel %vm238_vm8, %v456_v57, -inf }
 0x443   :  { %459 = vmax.xlane.f32.xlu2 %v458_v58 }
 0x447   :  { %v602_v62 = vpop.f32.mrf.mxu2 }
 0x448   :  { %v603_v63 = vadd.f32 %v602_v62, %v2672_v47 }
 0x44a   :  { %v605_v0 = vsel %vm238_vm8, %v603_v63, -inf }
 0x44b   :  { %606 = vmax.xlane.f32.xlu1 %v605_v0  ;;  %671 = vmax.xlane.f32.xlu2 %v670_v1 }
 0x44f   :  { %v732_v2 = vpop.f32.mrf.mxu2 }
 0x450   :  { %v733_v3 = vadd.f32 %v732_v2, %v2672_v47  ;;  %v2105_v2 = vld [vmem:[%s2979_s6 + $0x8] sm:$0xff] }
 0x451   :  { %817 = vmatpush.bf16.msrb.mxu3 %v2105_v2  ;;  %v2180_v2 = vld [vmem:[#allocation8] ss:$0 sm:$0xff] }
 0x452   :  { %v735_v4 = vsel %vm238_vm8, %v733_v3, -inf }
 0x453   :  { %736 = vmax.xlane.f32.xlu0 %v735_v4 }
 0x464   :  { %469 = vrot.lane.b32.xlu1 %v2596_v54, %s2459_s3 }
 0x467   :  { %551 = vrot.lane.b32.xlu0 %v2628_v8, %s2455_s30 }
 0x4a6   :  { %v542_v5 = vpop.xlane.xlu0 %541 }
 0x4a7   :  { %v543_v6 = vsub.f32 %v538_v52, %v542_v5 }
 0x4a9   :  { %v544_v7 = vmul.f32 1.442695, %v543_v6 }
 0x4ab   :  { %2211 = vpow2.f32 %v544_v7 }
 0x4b1   :  { %v2212_v9 = vpop.eup %2211 }
 0x4b2   :  { %v546_v11 = vsel %vm238_vm8, %v2212_v9, 0.0 }
 0x4b3   :  { %547 = vadd.xlane.f32.xlu2 %v546_v11 }
 0x4b6   :  { %v460_v12 = vpop.xlane.xlu2 %459 }
 0x4b7   :  { %v461_v13 = vsub.f32 %v456_v57, %v460_v12 }
 0x4b9   :  { %v462_v14 = vmul.f32 1.442695, %v461_v13 }
 0x4bb   :  { %2213 = vpow2.f32 %v462_v14 }
 0x4be   :  { %v607_v15 = vpop.xlane.xlu1 %606  ;;  %v672_v16 = vpop.xlane.xlu2 %671 }
 0x4bf   :  { %v608_v17 = vsub.f32 %v603_v63, %v607_v15  ;;  %v673_v18 = vsub.f32 %v668_v60, %v672_v16 }
 0x4c1   :  { %v2214_v54 = vpop.eup %2213  ;;  %v609_v19 = vmul.f32 1.442695, %v608_v17  ;;  %v674_v20 = vmul.f32 1.442695, %v673_v18 }
 0x4c2   :  { %v464_v21 = vsel %vm238_vm8, %v2214_v54, 0.0 }
 0x4c3   :  { %2215 = vpow2.f32 %v609_v19  ;;  %465 = vadd.xlane.f32.xlu1 %v464_v21 }
 0x4c4   :  { %2217 = vpow2.f32 %v674_v20 }
 0x4c6   :  { %v737_v22 = vpop.xlane.xlu0 %736 }
 0x4c7   :  { %v738_v23 = vsub.f32 %v733_v3, %v737_v22 }
 0x4c9   :  { %v2216_v24 = vpop.eup %2215  ;;  %v739_v25 = vmul.f32 1.442695, %v738_v23 }
 0x4ca   :  { %v2218_v26 = vpop.eup %2217  ;;  %v611_v27 = vsel %vm238_vm8, %v2216_v24, 0.0 }
 0x4cb   :  { %2219 = vpow2.f32 %v739_v25  ;;  %612 = vadd.xlane.f32.xlu0 %v611_v27  ;;  %v676_v28 = vsel %vm238_vm8, %v2218_v26, 0.0 }
 0x4cc   :  { %677 = vadd.xlane.f32.xlu2 %v676_v28 }
 0x4d1   :  { %v2220_v29 = vpop.eup %2219 }
 0x4d2   :  { %v741_v30 = vsel %vm238_vm8, %v2220_v29, 0.0 }
 0x4d4   :  { %742 = vadd.xlane.f32.xlu2 %v741_v30 }
 0x4d6   :  { %v470_v31 = vpop.permute.xlu1 %469 }
 0x4d7   :  { %490 = vmatpush.msrb.mxu1 %v470_v31 }
 0x4d9   :  { %v552_v32 = vpop.permute.xlu0 %551 }
 0x4da   :  { %572 = vmatpush.msrb.mxu0 %v552_v32 }
 0x4dc   :  { %681 = vrot.lane.b32.xlu1 %v2628_v8, %s2993_s18 }
 0x4df   :  { %746 = vrot.lane.b32.xlu0 %v2628_v8, %s2459_s3 }
 0x4ec   :  { %616 = vrot.lane.b32.xlu2 %v2628_v8, %s2456_s1 }
 0x526   :  { %v548_v33 = vpop.xlane.xlu2 %547 }
 0x527   :  { %2221 = vrcp.f32 %v548_v33 }
 0x52d   :  { %v2222_v34 = vpop.eup %2221 }
 0x52e   :  { %v550_v35 = vmul.f32 %v2222_v34, %v2212_v9 }
 0x530   :  { %1963 = vmatmul.msk.f32.vlgmr.msrb.gmra.mxu0 %vm238_vm8, %v550_v35 }
 0x536   :  { %v466_v36 = vpop.xlane.xlu1 %465 }
 0x537   :  { %2223 = vrcp.f32 %v466_v36 }
 0x53d   :  { %v2224_v37 = vpop.eup %2223 }
 0x53e   :  { %v468_v38 = vmul.f32 %v2224_v37, %v2214_v54  ;;  %v613_v40 = vpop.xlane.xlu0 %612 }
 0x53f   :  { %v678_v39 = vpop.xlane.xlu2 %677 }
 0x540   :  { %1960 = vmatmul.msk.f32.vlgmr.msrb.gmra.mxu1 %vm238_vm8, %v468_v38  ;;  %2225 = vrcp.f32 %v678_v39  ;;  %v2106_v38 = vld [vmem:[%s2983_s10] sm:$0xff] }
 0x541   :  { %2227 = vrcp.f32 %v613_v40 }
 0x546   :  { %v2226_v42 = vpop.eup %2225 }
 0x547   :  { %v743_v41 = vpop.xlane.xlu2 %742  ;;  %v2228_v43 = vpop.eup %2227  ;;  %v680_v8 = vmul.f32 %v2226_v42, %v2218_v26 }
 0x548   :  { %2229 = vrcp.f32 %v743_v41  ;;  %v615_v45 = vmul.f32 %v2228_v43, %v2216_v24 }
 0x54e   :  { %v682_v44 = vpop.permute.xlu1 %681  ;;  %v2230_v53 = vpop.eup %2229 }
 0x54f   :  { %v617_v51 = vpop.permute.xlu2 %616  ;;  %702 = vmatpush.msra.mxu0 %v682_v44  ;;  %v745_v56 = vmul.f32 %v2230_v53, %v2220_v29 }
 0x550   :  { %637 = vmatpush.msra.mxu1 %v617_v51  ;;  %1969 = vmatmul.msk.f32.vlgmr.msra.gmra.mxu0 %vm238_vm8, %v680_v8 }
 0x551   :  { %1966 = vmatmul.msk.f32.vlgmr.msra.gmra.mxu1 %vm238_vm8, %v615_v45  ;;  %v747_v52 = vpop.permute.xlu0 %746 }
 0x552   :  { %767 = vmatpush.msrb.mxu1 %v747_v52 }
 0x559   :  { %1972 = vmatmul.msk.f32.vlgmr.msrb.gmra.mxu1 %vm238_vm8, %v745_v56 }
 0x5ad   :  { %v574_v57 = vpop.f32.mrf.mxu0 }
 0x5bd   :  { %v492_v58 = vpop.f32.mrf.mxu1 }
 0x5cd   :  { %v704_v59 = vpop.f32.mrf.mxu0 }
 0x5ce   :  { %v639_v60 = vpop.f32.mrf.mxu1  ;;  %v2145_v62 = vpack.i.bf16 %v704_v59, %v2669_v46  ;;  %v2104_v46 = vld [vmem:[%s2979_s6] sm:$0xff] }
 0x5cf   :  { %v2150_v63 = vpack.i.bf16 %v639_v60, %v2678_v55  ;;  %818 = vmatpush.bf16.msrb.mxu3 %v2104_v46 }
 0x5d0   :  { %2146 = vrot.lane.b32.xlu0 %v2145_v62, %s2991_s0  ;;  %v2179_v62 = vld [vmem:[%s2981_s8] ss:$0 sm:$0xff] }
 0x5d1   :  { %2151 = vrot.lane.b32.xlu1 %v2150_v63, %s2992_s26 }
 0x5d6   :  { %v769_v0 = vpop.f32.mrf.mxu1 }
 0x5d7   :  { %v2155_v1 = vpack.i.bf16 %v769_v0, %v492_v58 }
 0x5d9   :  { %2156 = vrot.lane.b32.xlu1 %v2155_v1, %s2990_s15 }
 0x642   :  { %v2147_v3 = vpop.permute.xlu0 %2146 }
 0x643   :  { %v2152_v55 = vpop.permute.xlu1 %2151  ;;  %v2149_v6 = vunpack.i.h.bf16 %v2147_v3  ;;  %v2148_v7 = vunpack.i.l.bf16 %v2147_v3 }
 0x644   :  { %v2154_v4 = vunpack.i.h.bf16 %v2152_v55  ;;  %v2153_v5 = vunpack.i.l.bf16 %v2152_v55 }
 0x646   :  { %v784_v9 = vsel %vm238_vm8, %v574_v57, %v2154_v4  ;;  %v507_v11 = vsel %vm238_vm8, %v2674_v48, %v2153_v5  ;;  %v2178_v48 = vld [vmem:[%s2980_s7] ss:$0 sm:$0xff] }
 0x647   :  { %v509_v15 = vsel %vm508_vm9, %v507_v11, %v2148_v7  ;;  %v785_v16 = vsel %vm508_vm9, %v784_v9, %v2149_v6  ;;  %v2111_v7 = vld [vmem:[%s2985_s12 + $0x18] sm:$0xff]  ;;  %v2110_v9 = vld [vmem:[%s2985_s12 + $0x10] sm:$0xff]  ;;  %v2109_v11 = vld [vmem:[%s2985_s12 + $0x8] sm:$0xff] }
 0x648   :  { %984 = vmatpush.bf16.msrb.mxu2 %v2111_v7 }
 0x64b   :  { %v2157_v12 = vpop.permute.xlu1 %2156 }
 0x64c   :  { %v2159_v13 = vunpack.i.h.bf16 %v2157_v12  ;;  %v2158_v14 = vunpack.i.l.bf16 %v2157_v12  ;;  %985 = vmatpush.bf16.msrb.mxu2 %v2110_v9  ;;  %v2108_v12 = vld [vmem:[%s2985_s12] sm:$0xff] }
 0x64e   :  { %v786_v17 = vsel %vm510_vm10, %v785_v16, %v2159_v13  ;;  %v511_v18 = vsel %vm510_vm10, %v509_v15, %v2158_v14  ;;  %v2181_v13 = vld [vmem:[%s2984_s11] ss:$0 sm:$0xff] }
 0x64f   :  { %v787_v54 = vpack.c.bf16 %v786_v17, %v511_v18 }
 0x650   :  { %986 = vmatpush.bf16.msrb.mxu2 %v2109_v11 }
 0x651   :  { %1981 = vmatmul.msk.bf16.vlgmr.msrb.gmra.mxu3 %vm133_vm0, %v787_v54 }
 0x654   :  { %987 = vmatpush.bf16.msrb.mxu2 %v2108_v12 }
 0x6d4   :  { %v820_v19 = vpop.f32.mrf.mxu3 }
 0x6d5   :  { %v821_v20 = vadd.f32 %v2178_v48, %v820_v19 }
 0x6d7   :  { %v825_v21 = vadd.f32 %v821_v20, %v2586_v49 }
 0x6d9   :  { %v829_v22 = vsel %vm133_vm0, %v825_v21, 0.0 }
 0x6da   :  { %830 = vadd.xlane.f32.xlu0 %v829_v22 }
 0x6dc   :  { %v822_v23 = vpop.f32.mrf.mxu3 }
 0x6dd   :  { %v823_v24 = vadd.f32 %v2178_v48, %v822_v23 }
 0x6df   :  { %v826_v25 = vadd.f32 %v823_v24, %v2588_v50  ;;  %v2107_v50 = vld [vmem:[%s2983_s10 + $0x8] sm:$0xff] }
 0x6e0   :  { %913 = vmatpush.bf16.msrb.mxu0 %v2107_v50 }
 0x6e1   :  { %v832_v26 = vsel %vm133_vm0, %v826_v25, 0.0 }
 0x6e2   :  { %833 = vadd.xlane.f32.xlu2 %v832_v26 }
 0x6e4   :  { %914 = vmatpush.bf16.msrb.mxu0 %v2106_v38 }
 0x74d   :  { %v831_v27 = vpop.xlane.xlu0 %830 }
 0x74e   :  { %v835_v28 = vmul.f32 %v831_v27, %v2569_v10 }
 0x750   :  { %v837_v29 = vsub.f32 %v825_v21, %v835_v28 }
 0x752   :  { %v839_v30 = vmul.f32 %v837_v29, %v837_v29 }
 0x754   :  { %v841_v31 = vsel %vm133_vm0, %v839_v30, 0.0 }
 0x755   :  { %v834_v32 = vpop.xlane.xlu2 %833  ;;  %842 = vadd.xlane.f32.xlu1 %v841_v31 }
 0x756   :  { %v836_v49 = vmul.f32 %v834_v32, %v2569_v10 }
 0x758   :  { %v838_v33 = vsub.f32 %v826_v25, %v836_v49 }
 0x75a   :  { %v840_v34 = vmul.f32 %v838_v33, %v838_v33 }
 0x75c   :  { %v844_v35 = vsel %vm133_vm0, %v840_v34, 0.0  ;;  %v2182_v34 = vld [vmem:[%s2986_s13] ss:$0 sm:$0xff] }
 0x75d   :  { %845 = vadd.xlane.f32.xlu0 %v844_v35 }
 0x7c8   :  { %v843_v36 = vpop.xlane.xlu1 %842 }
 0x7c9   :  { %v847_v37 = vmul.f32 %v843_v36, %v2569_v10 }
 0x7cb   :  { %v849_v39 = vadd.f32 1e-12, %v847_v37 }
 0x7cd   :  { %2231 = vrsqrt.f32 %v849_v39  ;;  %vm857_vm12 = vweird.f32 %v849_v39 }
 0x7d0   :  { %v846_v40 = vpop.xlane.xlu0 %845 }
 0x7d1   :  { %v848_v41 = vmul.f32 %v846_v40, %v2569_v10 }
 0x7d3   :  { %v2232_v42 = vpop.eup %2231  ;;  %v850_v43 = vadd.f32 1e-12, %v848_v41 }
 0x7d4   :  { %v852_v8 = vmul.f32 %v2232_v42, %v849_v39  ;;  %vm858_vm11 = vweird.f32 %v2232_v42 }
 0x7d5   :  { %2233 = vrsqrt.f32 %v850_v43  ;;  %vm859_vm13 = vmor %vm857_vm12, %vm858_vm11  ;;  %vm867_vm15 = vweird.f32 %v850_v43 }
 0x7d6   :  { %v853_v44 = vmul.f32 %v2232_v42, %v852_v8 }
 0x7d8   :  { %v854_v45 = vmul.f32 0.5, %v853_v44 }
 0x7da   :  { %v855_v51 = vsub.f32 1.5, %v854_v45 }
 0x7db   :  { %v2234_v52 = vpop.eup %2233 }
 0x7dc   :  { %v856_v53 = vmul.f32 %v2232_v42, %v855_v51  ;;  %v862_v56 = vmul.f32 %v2234_v52, %v850_v43  ;;  %vm868_vm14 = vweird.f32 %v2234_v52 }
 0x7dd   :  { %vm869_vm1 = vmor %vm867_vm15, %vm868_vm14 }
 0x7de   :  { %v863_v57 = vmul.f32 %v2234_v52, %v862_v56  ;;  %v860_v58 = vsel %vm859_vm13, %v2232_v42, %v856_v53 }
 0x7df   :  { %v871_v63 = vmul.f32 %v860_v58, %v837_v29  ;;  %v2113_v58 = vld [vmem:[%s2977_s4 + $0x18] sm:$0xff] }
 0x7e0   :  { %v864_v59 = vmul.f32 0.5, %v863_v57  ;;  %1084 = vmatpush.bf16.msra.mxu1 %v2113_v58 }
 0x7e1   :  { %v876_v46 = vmul.f32 %v2179_v62, %v871_v63 }
 0x7e2   :  { %v865_v60 = vsub.f32 1.5, %v864_v59 }
 0x7e3   :  { %v881_v4 = vadd.f32 %v2180_v2, %v876_v46 }
 0x7e4   :  { %v866_v0 = vmul.f32 %v2234_v52, %v865_v60 }
 0x7e6   :  { %v870_v1 = vsel %vm869_vm1, %v2234_v52, %v866_v0 }
 0x7e7   :  { %v872_v55 = vmul.f32 %v870_v1, %v838_v33 }
 0x7e9   :  { %v877_v3 = vmul.f32 %v2179_v62, %v872_v55  ;;  %v2112_v62 = vld [vmem:[%s2977_s4 + $0x10] sm:$0xff] }
 0x7ea   :  { %1085 = vmatpush.bf16.msra.mxu1 %v2112_v62 }
 0x7eb   :  { %v882_v5 = vadd.f32 %v2180_v2, %v877_v3 }
 0x7ed   :  { %v883_v6 = vpack.c.bf16 %v882_v5, %v881_v4 }
 0x7ef   :  { %1990 = vmatmul.msk.bf16.vlgmr.msrb.gmra.mxu0 %vm133_vm0, %v883_v6 }
 0x86c   :  { %v916_v14 = vpop.f32.mrf.mxu0 }
 0x86d   :  { %v917_v15 = vadd.f32 %v2181_v13, %v916_v14 }
 0x86f   :  { %v923_v16 = vmul.f32 0.044715, %v917_v15  ;;  %v921_v29 = vmul.f32 0.5, %v917_v15 }
 0x871   :  { %v925_v17 = vmul.f32 %v923_v16, %v917_v15 }
 0x873   :  { %v927_v18 = vmul.f32 %v925_v17, %v917_v15 }
 0x874   :  { %v918_v54 = vpop.f32.mrf.mxu0 }
 0x875   :  { %v929_v48 = vadd.f32 %v927_v18, %v917_v15  ;;  %v919_v19 = vadd.f32 %v2181_v13, %v918_v54  ;;  %v2183_v15 = vld [vmem:[%s2987_s14] ss:$0 sm:$0xff]  ;;  %v2184_v54 = vld [vmem:[#allocation10] ss:$0 sm:$0xff] }
 0x877   :  { %v924_v20 = vmul.f32 0.044715, %v919_v19  ;;  %v931_v21 = vmul.f32 0.7978846, %v929_v48  ;;  %v922_v30 = vmul.f32 0.5, %v919_v19 }
 0x879   :  { %v926_v22 = vmul.f32 %v924_v20, %v919_v19  ;;  %2235 = vtanh.f32 %v931_v21 }
 0x87b   :  { %v928_v23 = vmul.f32 %v926_v22, %v919_v19 }
 0x87d   :  { %v930_v24 = vadd.f32 %v928_v23, %v919_v19 }
 0x87f   :  { %v932_v25 = vmul.f32 0.7978846, %v930_v24  ;;  %v2236_v26 = vpop.eup %2235  ;;  %v2185_v24 = vld [vmem:[%s2978_s5 + $0x1] ss:$0 sm:$0xff]  ;;  %s2997_s5 = smov 48  }
 0x880   :  { %v935_v27 = vadd.f32 1.0, %v2236_v26 }
 0x881   :  { %2237 = vtanh.f32 %v932_v25 }
 0x882   :  { %v937_v32 = vmul.f32 %v935_v27, %v921_v29 }
 0x887   :  { %v2238_v28 = vpop.eup %2237 }
 0x888   :  { %v936_v31 = vadd.f32 1.0, %v2238_v28 }
 0x88a   :  { %v938_v49 = vmul.f32 %v936_v31, %v922_v30 }
 0x88c   :  { %v939_v33 = vpack.c.bf16 %v938_v49, %v937_v32 }
 0x88e   :  { %2007 = vmatmul.msk.bf16.vlgmr.msrb.gmra.mxu2 %vm976_vm2, %v939_v33 }
 0x911   :  { %v989_v35 = vpop.f32.mrf.mxu2 }
 0x912   :  { %v990_v50 = vadd.f32 %v2182_v34, %v989_v35 }
 0x914   :  { %v994_v36 = vadd.f32 %v990_v50, %v881_v4 }
 0x916   :  { %v998_v37 = vsel %vm133_vm0, %v994_v36, 0.0 }
 0x917   :  { %999 = vadd.xlane.f32.xlu2 %v998_v37 }
 0x919   :  { %v991_v38 = vpop.f32.mrf.mxu2 }
 0x91a   :  { %v992_v39 = vadd.f32 %v2182_v34, %v991_v38 }
 0x91c   :  { %v995_v40 = vadd.f32 %v992_v39, %v882_v5 }
 0x91e   :  { %v1001_v41 = vsel %vm133_vm0, %v995_v40, 0.0 }
 0x91f   :  { %1002 = vadd.xlane.f32.xlu1 %v1001_v41 }
 0x98a   :  { %v1000_v42 = vpop.xlane.xlu2 %999 }
 0x98b   :  { %v1004_v43 = vmul.f32 %v1000_v42, %v2569_v10 }
 0x98d   :  { %v1006_v8 = vsub.f32 %v994_v36, %v1004_v43 }
 0x98f   :  { %v1008_v44 = vmul.f32 %v1006_v8, %v1006_v8 }
 0x991   :  { %v1010_v45 = vsel %vm133_vm0, %v1008_v44, 0.0 }
 0x992   :  { %v1003_v51 = vpop.xlane.xlu1 %1002  ;;  %1011 = vadd.xlane.f32.xlu0 %v1010_v45 }
 0x993   :  { %v1005_v52 = vmul.f32 %v1003_v51, %v2569_v10 }
 0x995   :  { %v1007_v53 = vsub.f32 %v995_v40, %v1005_v52 }
 0x997   :  { %v1009_v56 = vmul.f32 %v1007_v53, %v1007_v53 }
 0x999   :  { %v1013_v57 = vsel %vm133_vm0, %v1009_v56, 0.0 }
 0x99a   :  { %1014 = vadd.xlane.f32.xlu2 %v1013_v57 }
 0xa05   :  { %v1012_v59 = vpop.xlane.xlu0 %1011 }
 0xa06   :  { %v1016_v60 = vmul.f32 %v1012_v59, %v2569_v10 }
 0xa08   :  { %v1018_v63 = vadd.f32 1e-12, %v1016_v60 }
 0xa0a   :  { %2239 = vrsqrt.f32 %v1018_v63  ;;  %vm1026_vm4 = vweird.f32 %v1018_v63 }
 0xa0d   :  { %v1015_v0 = vpop.xlane.xlu2 %1014 }
 0xa0e   :  { %v1017_v1 = vmul.f32 %v1015_v0, %v2569_v10 }
 0xa10   :  { %v2240_v2 = vpop.eup %2239  ;;  %v1019_v46 = vadd.f32 1e-12, %v1017_v1 }
 0xa11   :  { %v1021_v55 = vmul.f32 %v2240_v2, %v1018_v63  ;;  %vm1027_vm3 = vweird.f32 %v2240_v2 }
 0xa12   :  { %2241 = vrsqrt.f32 %v1019_v46  ;;  %vm1028_vm5 = vmor %vm1026_vm4, %vm1027_vm3  ;;  %vm1036_vm7 = vweird.f32 %v1019_v46 }
 0xa13   :  { %v1022_v3 = vmul.f32 %v2240_v2, %v1021_v55 }
 0xa15   :  { %v1023_v4 = vmul.f32 0.5, %v1022_v3 }
 0xa17   :  { %v1024_v5 = vsub.f32 1.5, %v1023_v4 }
 0xa18   :  { %v2242_v6 = vpop.eup %2241 }
 0xa19   :  { %v1025_v7 = vmul.f32 %v2240_v2, %v1024_v5  ;;  %v1031_v9 = vmul.f32 %v2242_v6, %v1019_v46  ;;  %vm1037_vm6 = vweird.f32 %v2242_v6 }
 0xa1a   :  { %vm1038_vm11 = vmor %vm1036_vm7, %vm1037_vm6  ;;  %vm1919_vm6 = vcmask 254976  }
 0xa1b   :  { %v1032_v11 = vmul.f32 %v2242_v6, %v1031_v9  ;;  %v1029_v12 = vsel %vm1028_vm5, %v2240_v2, %v1025_v7  ;;  %vm1917_vm5 = vcmask 1040384  }
 0xa1c   :  { %v1040_v16 = vmul.f32 %v1029_v12, %v1006_v8 }
 0xa1d   :  { %v1033_v13 = vmul.f32 0.5, %v1032_v11 }
 0xa1e   :  { %v1045_v48 = vmul.f32 %v2183_v15, %v1040_v16 }
 0xa1f   :  { %v1034_v14 = vsub.f32 1.5, %v1033_v13 }
 0xa20   :  { %v2786_v21 = vadd.f32 %v2184_v54, %v1045_v48 }
 0xa21   :  { %v1035_v17 = vmul.f32 %v2242_v6, %v1034_v14 }
 0xa23   :  { %v1039_v18 = vsel %vm1038_vm11, %v2242_v6, %v1035_v17 }
 0xa24   :  { %v1041_v19 = vmul.f32 %v1039_v18, %v1007_v53 }
 0xa26   :  { %v1046_v20 = vmul.f32 %v2183_v15, %v1041_v19 }
 0xa28   :  { %v2788_v22 = vadd.f32 %v2184_v54, %v1046_v20 }
 0xa2a   :  { %v1052_v23 = vpack.c.bf16 %v2788_v22, %v2786_v21 }
 0xa2c   :  { %2021 = vmatmul.msk.bf16.vlgmr.msra.gmra.mxu1 %vm133_vm0, %v1052_v23 }
 0xaa9   :  { %v1087_v25 = vpop.f32.mrf.mxu1 }
 0xaaa   :  { %v2796_v26 = vadd.f32 %v2185_v24, %v1087_v25 }
 0xaac   :  { %1130 = vrot.lane.b32.xlu2 %v2796_v26, %s2455_s30  ;;  %1093 = vrot.lane.b32.xlu1 %v2796_v26, %s2451_s25 }
 0xab1   :  { %v1089_v27 = vpop.f32.mrf.mxu1 }
 0xab2   :  { %v2806_v28 = vadd.f32 %v2185_v24, %v1089_v27 }
 0xab4   :  { %1221 = vrot.lane.b32.xlu2 %v2796_v26, %s2453_s29  ;;  %1156 = vrot.lane.b32.xlu1 %v2796_v26, %s2450_s23 }
 0xabc   :  { %1432 = vrot.lane.b32.xlu2 %v2806_v28, %s2452_s27  ;;  %1288 = vrot.lane.b32.xlu1 %v2796_v26, %s2454_s28 }
 0xac4   :  { %1367 = vrot.lane.b32.xlu1 %v2806_v28, %s2451_s25  ;;  %s3000_s25 = smov 24  }
 0xacc   :  { %1497 = vrot.lane.b32.xlu1 %v2806_v28, %s2449_s2 }
 0xad4   :  { %1560 = vrot.lane.b32.xlu1 %v2806_v28, %s2458_s19 }
 0xb06   :  { %v1131_v29 = vpop.permute.xlu2 %1130 }
 0xb07   :  { %1151 = vmatpush.msra.mxu0 %v1131_v29 }
 0xb0e   :  { %v1222_v38 = vpop.permute.xlu2 %1221 }
 0xb16   :  { %v1433_v41 = vpop.permute.xlu2 %1432 }
 0xb1e   :  { %v1094_v30 = vpop.permute.xlu1 %1093 }
 0xb1f   :  { %2022 = vmatpush.xpose.msk.msra.mxu3 %vm238_vm8, %v1094_v30 }
 0xb22   :  { %2023 = vmatmul.msk.f32.vlgmr.msra.gmra.mxu3 %vm238_vm8, %v2796_v26 }
 0xb26   :  { %v1157_v50 = vpop.permute.xlu1 %1156 }
 0xb2e   :  { %v1289_v40 = vpop.permute.xlu1 %1288 }
 0xb36   :  { %v1368_v44 = vpop.permute.xlu1 %1367 }
 0xb3e   :  { %v1498_v51 = vpop.permute.xlu1 %1497 }
 0xb46   :  { %v1561_v57 = vpop.permute.xlu1 %1560 }
 0xba5   :  { %v1116_v31 = vpop.f32.mrf.mxu3 }
 0xba6   :  { %v1117_v32 = vadd.f32 %v1116_v31, %v2618_v61 }
 0xba8   :  { %v1119_v49 = vsel %vm238_vm8, %v1117_v32, -inf }
 0xba9   :  { %1120 = vmax.xlane.f32.xlu0 %v1119_v49 }
 0xbbd   :  { %1158 = vrot.lane.b32.xlu0 %v2796_v26, %s2452_s27 }
 0xbc5   :  { %1223 = vrot.lane.b32.xlu0 %v2796_v26, %s2449_s2  ;;  %s2998_s2 = smov 8  }
 0xbcd   :  { %1286 = vrot.lane.b32.xlu0 %v2796_v26, %s2458_s19 }
 0xbd5   :  { %1430 = vrot.lane.b32.xlu0 %v2806_v28, %s2450_s23  ;;  %s2999_s23 = smov 16  }
 0xbdd   :  { %1495 = vrot.lane.b32.xlu0 %v2806_v28, %s2453_s29  ;;  %s1928_s29 = sshll.u32 %s2989_s16, 4  ;;  %s1929_s29 = int_to_ptr.hbm [resolvable:$true] %s1928_s29 }
 0xc1c   :  { %v1121_v33 = vpop.xlane.xlu0 %1120 }
 0xc1d   :  { %v1122_v34 = vsub.f32 %v1117_v32, %v1121_v33 }
 0xc1f   :  { %v1123_v35 = vmul.f32 1.442695, %v1122_v34 }
 0xc21   :  { %2243 = vpow2.f32 %v1123_v35 }
 0xc27   :  { %v2244_v36 = vpop.eup %2243 }
 0xc28   :  { %v1125_v37 = vsel %vm238_vm8, %v2244_v36, 0.0 }
 0xc29   :  { %1126 = vadd.xlane.f32.xlu2 %v1125_v37 }
 0xc2f   :  { %v1159_v39 = vpop.permute.xlu0 %1158 }
 0xc30   :  { %2025 = vmatpush.xpose.msk.msrb.mxu1 %vm238_vm8, %v1159_v39 }
 0xc33   :  { %2026 = vmatmul.msk.f32.vlgmr.msrb.gmra.mxu1 %vm238_vm8, %v1157_v50 }
 0xc34   :  { %2031 = vmatpush.xpose.msk.msra.mxu1 %vm238_vm8, %v1289_v40 }
 0xc37   :  { %v1224_v42 = vpop.permute.xlu0 %1223 }
 0xc38   :  { %2037 = vmatpush.xpose.msk.msrb.mxu1 %vm238_vm8, %v1433_v41  ;;  %2028 = vmatpush.xpose.msk.msrb.mxu0 %vm238_vm8, %v1224_v42 }
 0xc3f   :  { %v1287_v43 = vpop.permute.xlu0 %1286 }
 0xc40   :  { %2032 = vmatmul.msk.f32.vlgmr.msra.gmra.mxu1 %vm238_vm8, %v1287_v43 }
 0xc41   :  { %1562 = vrot.lane.b32.xlu2 %v2806_v28, %s2454_s28 }
 0xc47   :  { %v1431_v8 = vpop.permute.xlu0 %1430 }
 0xc48   :  { %2038 = vmatmul.msk.f32.vlgmr.msrb.gmra.mxu1 %vm238_vm8, %v1431_v8 }
 0xc4f   :  { %v1496_v62 = vpop.permute.xlu0 %1495 }
 0xc9c   :  { %v1127_v45 = vpop.xlane.xlu2 %1126 }
 0xc9d   :  { %2245 = vrcp.f32 %v1127_v45 }
 0xca3   :  { %v2246_v52 = vpop.eup %2245 }
 0xca4   :  { %v1129_v53 = vmul.f32 %v2246_v52, %v2244_v36  ;;  %v1563_v56 = vpop.permute.xlu2 %1562 }
 0xca5   :  { %2043 = vmatpush.xpose.msk.msra.mxu1 %vm238_vm8, %v1563_v56 }
 0xca6   :  { %2024 = vmatmul.msk.f32.vlgmr.msra.gmra.mxu0 %vm238_vm8, %v1129_v53 }
 0xca7   :  { %2034 = vmatpush.xpose.msk.msra.mxu0 %vm238_vm8, %v1368_v44 }
 0xca8   :  { %2044 = vmatmul.msk.f32.vlgmr.msra.gmra.mxu1 %vm238_vm8, %v1561_v57 }
 0xcae   :  { %2029 = vmatmul.msk.f32.vlgmr.msrb.gmra.mxu0 %vm238_vm8, %v1222_v38 }
 0xcaf   :  { %2040 = vmatpush.xpose.msk.msrb.mxu0 %vm238_vm8, %v1498_v51 }
 0xcb0   :  { %v1181_v58 = vpop.f32.mrf.mxu1 }
 0xcb1   :  { %v1182_v59 = vadd.f32 %v1181_v58, %v2618_v61 }
 0xcb3   :  { %v1184_v60 = vsel %vm238_vm8, %v1182_v59, -inf }
 0xcb4   :  { %1185 = vmax.xlane.f32.xlu2 %v1184_v60 }
 0xcb6   :  { %2035 = vmatmul.msk.f32.vlgmr.msra.gmra.mxu0 %vm238_vm8, %v2806_v28 }
 0xcbd   :  { %v1311_v63 = vpop.f32.mrf.mxu1 }
 0xcbe   :  { %v1312_v0 = vadd.f32 %v1311_v63, %v2618_v61  ;;  %2041 = vmatmul.msk.f32.vlgmr.msrb.gmra.mxu0 %vm238_vm8, %v1496_v62 }
 0xcc0   :  { %v1314_v1 = vsel %vm238_vm8, %v1312_v0, -inf }
 0xcc1   :  { %1315 = vmax.xlane.f32.xlu1 %v1314_v1 }
 0xcc5   :  { %v1455_v6 = vpop.f32.mrf.mxu1 }
 0xcc6   :  { %v1456_v9 = vadd.f32 %v1455_v6, %v2672_v47 }
 0xcc8   :  { %v1458_v15 = vsel %vm238_vm8, %v1456_v9, -inf }
 0xd23   :  { %v2856_v2 = vpop.f32.mrf.mxu0 }
 0xd25   :  { %v1585_v17 = vpop.f32.mrf.mxu1 }
 0xd26   :  { %v1586_v18 = vadd.f32 %v1585_v17, %v2672_v47 }
 0xd27   :  { %v1186_v46 = vpop.xlane.xlu2 %1185 }
 0xd28   :  { %v1187_v4 = vsub.f32 %v1182_v59, %v1186_v46  ;;  %v1588_v19 = vsel %vm238_vm8, %v1586_v18, -inf }
 0xd2a   :  { %v1188_v7 = vmul.f32 1.442695, %v1187_v4 }
 0xd2b   :  { %v1246_v55 = vpop.f32.mrf.mxu0 }
 0xd2c   :  { %v1247_v3 = vadd.f32 %v1246_v55, %v2618_v61  ;;  %2247 = vpow2.f32 %v1188_v7 }
 0xd2e   :  { %v1249_v5 = vsel %vm238_vm8, %v1247_v3, -inf }
 0xd2f   :  { %1250 = vmax.xlane.f32.xlu0 %v1249_v5 }
 0xd32   :  { %v2248_v54 = vpop.eup %2247 }
 0xd33   :  { %v1390_v11 = vpop.f32.mrf.mxu0  ;;  %v1190_v48 = vsel %vm238_vm8, %v2248_v54, 0.0 }
 0xd34   :  { %v1391_v12 = vadd.f32 %v1390_v11, %v2672_v47  ;;  %v1316_v13 = vpop.xlane.xlu1 %1315 }
 0xd35   :  { %v1317_v14 = vsub.f32 %v1312_v0, %v1316_v13 }
 0xd36   :  { %v1393_v16 = vsel %vm238_vm8, %v1391_v12, -inf }
 0xd37   :  { %1459 = vmax.xlane.f32.xlu0 %v1458_v15  ;;  %1394 = vmax.xlane.f32.xlu2 %v1393_v16  ;;  %v1318_v61 = vmul.f32 1.442695, %v1317_v14 }
 0xd39   :  { %2249 = vpow2.f32 %v1318_v61 }
 0xd3b   :  { %v1520_v38 = vpop.f32.mrf.mxu0 }
 0xd3c   :  { %v1521_v41 = vadd.f32 %v1520_v38, %v2672_v47 }
 0xd3e   :  { %v1523_v45 = vsel %vm238_vm8, %v1521_v41, -inf }
 0xd3f   :  { %1191 = vadd.xlane.f32.xlu0 %v1190_v48  ;;  %1589 = vmax.xlane.f32.xlu2 %v1588_v19  ;;  %v2250_v20 = vpop.eup %2249 }
 0xd40   :  { %v1320_v23 = vsel %vm238_vm8, %v2250_v20, 0.0 }
 0xd47   :  { %1321 = vadd.xlane.f32.xlu2 %v1320_v23 }
 0xd53   :  { %1195 = vrot.lane.b32.xlu0 %v2796_v26, %s2456_s1 }
 0xd5b   :  { %1325 = vrot.lane.b32.xlu0 %v2796_v26, %s2459_s3 }
 0xd5f   :  { %1260 = vrot.lane.b32.xlu2 %v2796_v26, %s2997_s5 }
 0xd63   :  { %1404 = vrot.lane.b32.xlu0 %v2806_v28, %s2455_s30 }
 0xd67   :  { %1469 = vrot.lane.b32.xlu2 %v2806_v28, %s2456_s1 }
 0xd6b   :  { %1534 = vrot.lane.b32.xlu0 %v2806_v28, %s2997_s5 }
 0xda2   :  { %v1251_v24 = vpop.xlane.xlu0 %1250 }
 0xda3   :  { %v1252_v36 = vsub.f32 %v1247_v3, %v1251_v24 }
 0xda5   :  { %v1253_v39 = vmul.f32 1.442695, %v1252_v36 }
 0xdaa   :  { %v1460_v25 = vpop.xlane.xlu0 %1459  ;;  %v1395_v27 = vpop.xlane.xlu2 %1394 }
 0xdab   :  { %v1461_v29 = vsub.f32 %v1456_v9, %v1460_v25  ;;  %v1396_v43 = vsub.f32 %v1391_v12, %v1395_v27 }
 0xdad   :  { %v1462_v30 = vmul.f32 1.442695, %v1461_v29  ;;  %v1397_v51 = vmul.f32 1.442695, %v1396_v43 }
 0xdaf   :  { %2251 = vpow2.f32 %v1462_v30 }
 0xdb2   :  { %v1590_v31 = vpop.xlane.xlu2 %1589  ;;  %v1192_v34 = vpop.xlane.xlu0 %1191 }
 0xdb3   :  { %v1591_v32 = vsub.f32 %v1586_v18, %v1590_v31 }
 0xdb5   :  { %v2252_v49 = vpop.eup %2251  ;;  %v1592_v33 = vmul.f32 1.442695, %v1591_v32  ;;  %v2115_v32 = vld [vmem:[%s2979_s6 + $0x18] sm:$0xff] }
 0xdb6   :  { %v1464_v26 = vsel %vm238_vm8, %v2252_v49, 0.0  ;;  %1672 = vmatpush.bf16.msra.mxu0 %v2115_v32 }
 0xdb7   :  { %2253 = vpow2.f32 %v1592_v33  ;;  %1465 = vadd.xlane.f32.xlu1 %v1464_v26 }
 0xdb8   :  { %2255 = vrcp.f32 %v1192_v34 }
 0xdba   :  { %v1322_v35 = vpop.xlane.xlu2 %1321 }
 0xdbb   :  { %2257 = vrcp.f32 %v1322_v35 }
 0xdbc   :  { %2259 = vpow2.f32 %v1253_v39 }
 0xdbd   :  { %v2881_v50 = vpop.eup %2253  ;;  %2261 = vpow2.f32 %v1397_v51  ;;  %v2186_v51 = vld [vmem:[%s2980_s7 + $0x1] ss:$0 sm:$0xff] }
 0xdbe   :  { %v1594_v37 = vsel %vm238_vm8, %v2881_v50, 0.0  ;;  %v2256_v40 = vpop.eup %2255 }
 0xdbf   :  { %1595 = vadd.xlane.f32.xlu1 %v1594_v37  ;;  %v1194_v8 = vmul.f32 %v2256_v40, %v2248_v54 }
 0xdc1   :  { %v2258_v52 = vpop.eup %2257 }
 0xdc2   :  { %v1261_v42 = vpop.permute.xlu2 %1260  ;;  %v2260_v53 = vpop.eup %2259  ;;  %v1324_v56 = vmul.f32 %v2258_v52, %v2250_v20 }
 0xdc3   :  { %1281 = vmatpush.msra.mxu2 %v1261_v42  ;;  %v1255_v47 = vsel %vm238_vm8, %v2260_v53, 0.0  ;;  %v2262_v59 = vpop.eup %2261 }
 0xdc4   :  { %v1399_v62 = vsel %vm238_vm8, %v2262_v59, 0.0 }
 0xdc5   :  { %v1196_v44 = vpop.permute.xlu0 %1195 }
 0xdc6   :  { %1216 = vmatpush.msrb.mxu3 %v1196_v44 }
 0xdc7   :  { %2027 = vmatmul.msk.f32.vlgmr.msrb.gmra.mxu3 %vm238_vm8, %v1194_v8  ;;  %1524 = vmax.xlane.f32.xlu1 %v1523_v45 }
 0xdca   :  { %v1470_v58 = vpop.permute.xlu2 %1469 }
 0xdcd   :  { %v1326_v57 = vpop.permute.xlu0 %1325 }
 0xdce   :  { %1346 = vmatpush.msra.mxu3 %v1326_v57 }
 0xdcf   :  { %1256 = vadd.xlane.f32.xlu1 %v1255_v47  ;;  %2033 = vmatmul.msk.f32.vlgmr.msra.gmra.mxu3 %vm238_vm8, %v1324_v56 }
 0xdd0   :  { %1490 = vmatpush.msrb.mxu3 %v1470_v58 }
 0xdd5   :  { %v1405_v60 = vpop.permute.xlu0 %1404 }
 0xdd6   :  { %1425 = vmatpush.msrb.mxu2 %v1405_v60 }
 0xdd7   :  { %1400 = vadd.xlane.f32.xlu1 %v1399_v62 }
 0xddd   :  { %v1535_v13 = vpop.permute.xlu0 %1534 }
 0xe2a   :  { %v1466_v63 = vpop.xlane.xlu1 %1465 }
 0xe2b   :  { %2263 = vrcp.f32 %v1466_v63 }
 0xe31   :  { %v2264_v0 = vpop.eup %2263 }
 0xe32   :  { %v1468_v1 = vmul.f32 %v2264_v0, %v2252_v49  ;;  %v1596_v46 = vpop.xlane.xlu1 %1595  ;;  %v2114_v49 = vld [vmem:[%s2979_s6 + $0x10] sm:$0xff] }
 0xe33   :  { %1673 = vmatpush.bf16.msra.mxu0 %v2114_v49 }
 0xe34   :  { %2039 = vmatmul.msk.f32.vlgmr.msrb.gmra.mxu3 %vm238_vm8, %v1468_v1 }
 0xe3a   :  { %v1525_v55 = vpop.xlane.xlu1 %1524 }
 0xe3b   :  { %v1526_v3 = vsub.f32 %v1521_v41, %v1525_v55 }
 0xe3d   :  { %v1527_v4 = vmul.f32 1.442695, %v1526_v3 }
 0xe3f   :  { %2265 = vpow2.f32 %v1527_v4 }
 0xe42   :  { %v1257_v5 = vpop.xlane.xlu1 %1256 }
 0xe43   :  { %2267 = vrcp.f32 %v1257_v5 }
 0xe45   :  { %v2266_v6 = vpop.eup %2265 }
 0xe46   :  { %v1529_v7 = vsel %vm238_vm8, %v2266_v6, 0.0 }
 0xe47   :  { %1530 = vadd.xlane.f32.xlu1 %v1529_v7 }
 0xe49   :  { %v2268_v9 = vpop.eup %2267 }
 0xe4a   :  { %v1259_v11 = vmul.f32 %v2268_v9, %v2260_v53  ;;  %v1401_v12 = vpop.xlane.xlu1 %1400  ;;  %v1218_v16 = vpop.f32.mrf.mxu3  ;;  %v2116_v9 = vld [vmem:[%s2983_s10 + $0x10] sm:$0xff] }
 0xe4b   :  { %2269 = vrcp.f32 %v1401_v12 }
 0xe4c   :  { %2030 = vmatmul.msk.f32.vlgmr.msra.gmra.mxu2 %vm238_vm8, %v1259_v11 }
 0xe4d   :  { %1555 = vmatpush.msra.mxu2 %v1535_v13 }
 0xe51   :  { %v2270_v14 = vpop.eup %2269 }
 0xe52   :  { %v1403_v15 = vmul.f32 %v2270_v14, %v2262_v59  ;;  %v1348_v17 = vpop.f32.mrf.mxu3 }
 0xe54   :  { %2036 = vmatmul.msk.f32.vlgmr.msrb.gmra.mxu2 %vm238_vm8, %v1403_v15 }
 0xe60   :  { %1599 = vrot.lane.b32.xlu1 %v2806_v28, %s2459_s3 }
 0xeb7   :  { %v1492_v61 = vpop.f32.mrf.mxu3 }
 0xeb8   :  { %v2160_v18 = vpack.i.bf16 %v1492_v61, %v1218_v16 }
 0xeba   :  { %2161 = vrot.lane.b32.xlu2 %v2160_v18, %s2998_s2  ;;  %v1531_v54 = vpop.xlane.xlu1 %1530  ;;  %s2461_s2 = smov [#allocation11]  }
 0xebb   :  { %2271 = vrcp.f32 %v1531_v54 }
 0xebc   :  { %2273 = vrcp.f32 %v1596_v46 }
 0xec1   :  { %v2272_v48 = vpop.eup %2271 }
 0xec2   :  { %v1533_v19 = vmul.f32 %v2272_v48, %v2266_v6  ;;  %v2274_v20 = vpop.eup %2273 }
 0xec3   :  { %v1598_v23 = vmul.f32 %v2274_v20, %v2881_v50 }
 0xec4   :  { %2042 = vmatmul.msk.f32.vlgmr.msra.gmra.mxu2 %vm238_vm8, %v1533_v19 }
 0xecf   :  { %v1283_v28 = vpop.f32.mrf.mxu2 }
 0xed2   :  { %v1600_v24 = vpop.permute.xlu1 %1599 }
 0xed3   :  { %1620 = vmatpush.msra.mxu3 %v1600_v24 }
 0xed4   :  { %2045 = vmatmul.msk.f32.vlgmr.msra.gmra.mxu3 %vm238_vm8, %v1598_v23 }
 0xed7   :  { %v1427_v25 = vpop.f32.mrf.mxu2 }
 0xf14   :  { %v2162_v33 = vpop.permute.xlu2 %2161 }
 0xf15   :  { %v2164_v26 = vunpack.i.h.bf16 %v2162_v33  ;;  %v2163_v34 = vunpack.i.l.bf16 %v2162_v33 }
 0xf17   :  { %v1363_v38 = vsel %vm238_vm8, %v2856_v2, %v2163_v34  ;;  %v1637_v39 = vsel %vm238_vm8, %v1427_v25, %v2164_v26 }
 0xf47   :  { %v1557_v27 = vpop.f32.mrf.mxu2 }
 0xf48   :  { %v2165_v29 = vpack.i.bf16 %v1557_v27, %v1283_v28  ;;  %v2187_v28 = vld [vmem:[%s2981_s8 + $0x1] ss:$0 sm:$0xff] }
 0xf4a   :  { %2166 = vrot.lane.b32.xlu0 %v2165_v29, %s2999_s23  ;;  %s1926_s23 = sshll.u32 %s2461_s2, 4  ;;  %s1927_s23 = int_to_ptr.vmem [resolvable:$true] %s1926_s23 }
 0xf57   :  { %v1622_v30 = vpop.f32.mrf.mxu3 }
 0xf58   :  { %v2170_v31 = vpack.i.bf16 %v1622_v30, %v1348_v17  ;;  %v2188_v30 = vld [vmem:[#allocation8 + $0x1] ss:$0 sm:$0xff] }
 0xf5a   :  { %2171 = vrot.lane.b32.xlu2 %v2170_v31, %s3000_s25 }
 0xfb4   :  { %v2172_v35 = vpop.permute.xlu2 %2171 }
 0xfb5   :  { %v2174_v40 = vunpack.i.h.bf16 %v2172_v35  ;;  %v2173_v41 = vunpack.i.l.bf16 %v2172_v35  ;;  %v2121_v35 = vld [vmem:[%s2985_s12 + $0x38] sm:$0xff] }
 0xfb6   :  { %1844 = vmatpush.bf16.msrb.mxu1 %v2121_v35 }
 0xfbc   :  { %v2167_v50 = vpop.permute.xlu0 %2166 }
 0xfbd   :  { %v2169_v36 = vunpack.i.h.bf16 %v2167_v50  ;;  %v2168_v37 = vunpack.i.l.bf16 %v2167_v50  ;;  %v2120_v50 = vld [vmem:[%s2985_s12 + $0x30] sm:$0xff] }
 0xfbe   :  { %1845 = vmatpush.bf16.msrb.mxu1 %v2120_v50 }
 0xfbf   :  { %v1638_v42 = vsel %vm508_vm9, %v1637_v39, %v2169_v36  ;;  %v1364_v43 = vsel %vm508_vm9, %v1363_v38, %v2168_v37  ;;  %v2119_v36 = vld [vmem:[%s2985_s12 + $0x28] sm:$0xff]  ;;  %v2118_v37 = vld [vmem:[%s2985_s12 + $0x20] sm:$0xff] }
 0xfc0   :  { %v1365_v8 = vsel %vm510_vm10, %v1364_v43, %v2173_v41  ;;  %v1639_v44 = vsel %vm510_vm10, %v1638_v42, %v2174_v40  ;;  %v2189_v38 = vld [vmem:[%s2984_s11 + $0x1] ss:$0 sm:$0xff] }
 0xfc1   :  { %v1640_v45 = vpack.c.bf16 %v1639_v44, %v1365_v8 }
 0xfc2   :  { %1846 = vmatpush.bf16.msrb.mxu1 %v2119_v36 }
 0xfc3   :  { %2059 = vmatmul.msk.bf16.vlgmr.msra.gmra.mxu0 %vm133_vm0, %v1640_v45 }
 0xfc6   :  { %1847 = vmatpush.bf16.msrb.mxu1 %v2118_v37 }
0x1040   :  { %v1675_v2 = vpop.f32.mrf.mxu0 }
0x1041   :  { %v1676_v52 = vadd.f32 %v2186_v51, %v1675_v2 }
0x1043   :  { %v1680_v53 = vadd.f32 %v1676_v52, %v2786_v21 }
0x1045   :  { %v1686_v56 = vsel %vm133_vm0, %v1680_v53, 0.0 }
0x1046   :  { %1687 = vadd.xlane.f32.xlu0 %v1686_v56 }
0x1048   :  { %v1677_v57 = vpop.f32.mrf.mxu0 }
0x1049   :  { %v1678_v47 = vadd.f32 %v2186_v51, %v1677_v57 }
0x104b   :  { %v1681_v58 = vadd.f32 %v1678_v47, %v2788_v22  ;;  %v2117_v22 = vld [vmem:[%s2983_s10 + $0x18] sm:$0xff] }
0x104c   :  { %1772 = vmatpush.bf16.msrb.mxu2 %v2117_v22 }
0x104d   :  { %v1689_v59 = vsel %vm133_vm0, %v1681_v58, 0.0 }
0x104e   :  { %1690 = vadd.xlane.f32.xlu2 %v1689_v59 }
0x1050   :  { %1773 = vmatpush.bf16.msrb.mxu2 %v2116_v9 }
0x10b9   :  { %v1688_v60 = vpop.xlane.xlu0 %1687 }
0x10ba   :  { %v1692_v62 = vmul.f32 %v1688_v60, %v2569_v10 }
0x10bc   :  { %v1694_v63 = vsub.f32 %v1680_v53, %v1692_v62 }
0x10be   :  { %v1696_v0 = vmul.f32 %v1694_v63, %v1694_v63 }
0x10c0   :  { %v1698_v1 = vsel %vm133_vm0, %v1696_v0, 0.0 }
0x10c1   :  { %v1691_v46 = vpop.xlane.xlu2 %1690  ;;  %1699 = vadd.xlane.f32.xlu1 %v1698_v1 }
0x10c2   :  { %v1693_v21 = vmul.f32 %v1691_v46, %v2569_v10 }
0x10c4   :  { %v1695_v55 = vsub.f32 %v1681_v58, %v1693_v21  ;;  %v2190_v21 = vld [vmem:[%s2986_s13 + $0x1] ss:$0 sm:$0xff] }
0x10c6   :  { %v1697_v3 = vmul.f32 %v1695_v55, %v1695_v55 }
0x10c8   :  { %v1701_v4 = vsel %vm133_vm0, %v1697_v3, 0.0 }
0x10c9   :  { %1702 = vadd.xlane.f32.xlu2 %v1701_v4 }
0x1134   :  { %v1700_v5 = vpop.xlane.xlu1 %1699 }
0x1135   :  { %v1704_v6 = vmul.f32 %v1700_v5, %v2569_v10 }
0x1137   :  { %v1706_v7 = vadd.f32 1e-12, %v1704_v6 }
0x1139   :  { %2275 = vrsqrt.f32 %v1706_v7  ;;  %vm1714_vm9 = vweird.f32 %v1706_v7 }
0x113c   :  { %v1703_v11 = vpop.xlane.xlu2 %1702 }
0x113d   :  { %v1705_v12 = vmul.f32 %v1703_v11, %v2569_v10 }
0x113f   :  { %v2276_v13 = vpop.eup %2275  ;;  %v1707_v14 = vadd.f32 1e-12, %v1705_v12 }
0x1140   :  { %v1709_v15 = vmul.f32 %v2276_v13, %v1706_v7  ;;  %vm1715_vm8 = vweird.f32 %v2276_v13 }
0x1141   :  { %2277 = vrsqrt.f32 %v1707_v14  ;;  %vm1716_vm10 = vmor %vm1714_vm9, %vm1715_vm8  ;;  %vm1724_vm13 = vweird.f32 %v1707_v14 }
0x1142   :  { %v1710_v16 = vmul.f32 %v2276_v13, %v1709_v15 }
0x1144   :  { %v1711_v17 = vmul.f32 0.5, %v1710_v16 }
0x1146   :  { %v1712_v61 = vsub.f32 1.5, %v1711_v17 }
0x1147   :  { %v2278_v18 = vpop.eup %2277 }
0x1148   :  { %v1713_v54 = vmul.f32 %v2276_v13, %v1712_v61  ;;  %v1719_v48 = vmul.f32 %v2278_v18, %v1707_v14  ;;  %vm1725_vm12 = vweird.f32 %v2278_v18 }
0x1149   :  { %vm1726_vm14 = vmor %vm1724_vm13, %vm1725_vm12 }
0x114a   :  { %v1720_v19 = vmul.f32 %v2278_v18, %v1719_v48  ;;  %v1717_v20 = vsel %vm1716_vm10, %v2276_v13, %v1713_v54 }
0x114b   :  { %v1728_v25 = vmul.f32 %v1717_v20, %v1694_v63 }
0x114c   :  { %v1721_v23 = vmul.f32 0.5, %v1720_v19 }
0x114d   :  { %v1733_v31 = vmul.f32 %v2187_v28, %v1728_v25 }
0x114e   :  { %v1722_v24 = vsub.f32 1.5, %v1721_v23 }
0x114f   :  { %v1738_v33 = vadd.f32 %v2188_v30, %v1733_v31 }
0x1150   :  { %v1723_v27 = vmul.f32 %v2278_v18, %v1722_v24 }
0x1152   :  { %v1727_v29 = vsel %vm1726_vm14, %v2278_v18, %v1723_v27 }
0x1153   :  { %v1729_v32 = vmul.f32 %v1727_v29, %v1695_v55 }
0x1155   :  { %v1734_v49 = vmul.f32 %v2187_v28, %v1729_v32 }
0x1157   :  { %v1739_v26 = vadd.f32 %v2188_v30, %v1734_v49 }
0x1159   :  { %v1740_v34 = vpack.c.bf16 %v1739_v26, %v1738_v33 }
0x115b   :  { %2074 = vmatmul.msk.bf16.vlgmr.msrb.gmra.mxu2 %vm133_vm0, %v1740_v34 }
0x11de   :  { %v1775_v39 = vpop.f32.mrf.mxu2 }
0x11df   :  { %v1776_v40 = vadd.f32 %v2189_v38, %v1775_v39 }
0x11e1   :  { %v1782_v41 = vmul.f32 0.044715, %v1776_v40  ;;  %v1780_v60 = vmul.f32 0.5, %v1776_v40 }
0x11e3   :  { %v1784_v42 = vmul.f32 %v1782_v41, %v1776_v40 }
0x11e5   :  { %v1786_v43 = vmul.f32 %v1784_v42, %v1776_v40  ;;  %v2192_v42 = vld [vmem:[#allocation10 + $0x1] ss:$0 sm:$0xff] }
0x11e6   :  { %v1777_v8 = vpop.f32.mrf.mxu2 }
0x11e7   :  { %v1788_v44 = vadd.f32 %v1786_v43, %v1776_v40  ;;  %v1778_v45 = vadd.f32 %v2189_v38, %v1777_v8 }
0x11e9   :  { %v1783_v51 = vmul.f32 0.044715, %v1778_v45  ;;  %v1790_v2 = vmul.f32 0.7978846, %v1788_v44  ;;  %v1781_v62 = vmul.f32 0.5, %v1778_v45 }
0x11eb   :  { %v1785_v52 = vmul.f32 %v1783_v51, %v1778_v45  ;;  %2279 = vtanh.f32 %v1790_v2 }
0x11ed   :  { %v1787_v53 = vmul.f32 %v1785_v52, %v1778_v45 }
0x11ef   :  { %v1789_v56 = vadd.f32 %v1787_v53, %v1778_v45 }
0x11f1   :  { %v1791_v57 = vmul.f32 0.7978846, %v1789_v56  ;;  %v2280_v47 = vpop.eup %2279 }
0x11f2   :  { %v1794_v58 = vadd.f32 1.0, %v2280_v47 }
0x11f3   :  { %2281 = vtanh.f32 %v1791_v57 }
0x11f4   :  { %v1796_v0 = vmul.f32 %v1794_v58, %v1780_v60 }
0x11f9   :  { %v2282_v59 = vpop.eup %2281 }
0x11fa   :  { %v1795_v63 = vadd.f32 1.0, %v2282_v59 }
0x11fc   :  { %v1797_v1 = vmul.f32 %v1795_v63, %v1781_v62 }
0x11fe   :  { %v1798_v46 = vpack.c.bf16 %v1797_v1, %v1796_v0 }
0x1200   :  { %2100 = vmatmul.msk.bf16.vlgmr.msrb.gmra.mxu1 %vm976_vm2, %v1798_v46 }
0x127d   :  { %v1849_v55 = vpop.f32.mrf.mxu1 }
0x127e   :  { %v1850_v3 = vadd.f32 %v2190_v21, %v1849_v55 }
0x1280   :  { %v1854_v4 = vadd.f32 %v1850_v3, %v1738_v33 }
0x1282   :  { %v1860_v22 = vsel %vm133_vm0, %v1854_v4, 0.0 }
0x1283   :  { %1861 = vadd.xlane.f32.xlu2 %v1860_v22 }
0x1285   :  { %v1851_v5 = vpop.f32.mrf.mxu1 }
0x1286   :  { %v1852_v6 = vadd.f32 %v2190_v21, %v1851_v5 }
0x1288   :  { %v1855_v7 = vadd.f32 %v1852_v6, %v1739_v26 }
0x128a   :  { %v1863_v9 = vsel %vm133_vm0, %v1855_v7, 0.0 }
0x128b   :  { %1864 = vadd.xlane.f32.xlu0 %v1863_v9 }
0x12f6   :  { %v1862_v11 = vpop.xlane.xlu2 %1861 }
0x12f7   :  { %v1866_v12 = vmul.f32 %v1862_v11, %v2569_v10 }
0x12f9   :  { %v1868_v13 = vsub.f32 %v1854_v4, %v1866_v12 }
0x12fb   :  { %v1870_v14 = vmul.f32 %v1868_v13, %v1868_v13 }
0x12fd   :  { %v1872_v15 = vsel %vm133_vm0, %v1870_v14, 0.0 }
0x12fe   :  { %v1865_v16 = vpop.xlane.xlu0 %1864  ;;  %1873 = vadd.xlane.f32.xlu0 %v1872_v15 }
0x12ff   :  { %v1867_v17 = vmul.f32 %v1865_v16, %v2569_v10 }
0x1301   :  { %v1869_v61 = vsub.f32 %v1855_v7, %v1867_v17 }
0x1303   :  { %v1871_v18 = vmul.f32 %v1869_v61, %v1869_v61 }
0x1305   :  { %v1875_v54 = vsel %vm133_vm0, %v1871_v18, 0.0 }
0x1306   :  { %1876 = vadd.xlane.f32.xlu1 %v1875_v54 }
0x1371   :  { %v1874_v48 = vpop.xlane.xlu0 %1873 }
0x1372   :  { %v1878_v19 = vmul.f32 %v1874_v48, %v2569_v10 }
0x1374   :  { %v1880_v20 = vadd.f32 1e-12, %v1878_v19 }
0x1376   :  { %2283 = vrsqrt.f32 %v1880_v20  ;;  %vm1888_vm15 = vweird.f32 %v1880_v20 }
0x1379   :  { %v1877_v23 = vpop.xlane.xlu1 %1876 }
0x137a   :  { %v1879_v24 = vmul.f32 %v1877_v23, %v2569_v10  ;;  %v2191_v10 = vld [vmem:[%s2987_s14 + $0x1] ss:$0 sm:$0xff] }
0x137c   :  { %v2284_v28 = vpop.eup %2283  ;;  %v1881_v25 = vadd.f32 1e-12, %v1879_v24 }
0x137d   :  { %v1883_v27 = vmul.f32 %v2284_v28, %v1880_v20  ;;  %vm1889_vm0 = vweird.f32 %v2284_v28 }
0x137e   :  { %2285 = vrsqrt.f32 %v1881_v25  ;;  %vm1890_vm1 = vmor %vm1888_vm15, %vm1889_vm0  ;;  %vm1898_vm3 = vweird.f32 %v1881_v25 }
0x137f   :  { %v1884_v29 = vmul.f32 %v2284_v28, %v1883_v27 }
0x1381   :  { %v1885_v30 = vmul.f32 0.5, %v1884_v29 }
0x1383   :  { %v1886_v31 = vsub.f32 1.5, %v1885_v30 }
0x1384   :  { %v2286_v32 = vpop.eup %2285 }
0x1385   :  { %v1893_v49 = vmul.f32 %v2286_v32, %v1881_v25  ;;  %v1887_v33 = vmul.f32 %v2284_v28, %v1886_v31  ;;  %vm1899_vm2 = vweird.f32 %v2286_v32 }
0x1386   :  { %vm1900_vm4 = vmor %vm1898_vm3, %vm1899_vm2 }
0x1387   :  { %v1894_v26 = vmul.f32 %v2286_v32, %v1893_v49  ;;  %v1891_v35 = vsel %vm1890_vm1, %v2284_v28, %v1887_v33 }
0x1388   :  { %v1902_v37 = vmul.f32 %v1891_v35, %v1868_v13 }
0x1389   :  { %v1895_v34 = vmul.f32 0.5, %v1894_v26 }
0x138a   :  { %v1907_v40 = vmul.f32 %v2191_v10, %v1902_v37 }
0x138b   :  { %v1896_v50 = vsub.f32 1.5, %v1895_v34 }
0x138c   :  { %v1912_v8 = vadd.f32 %v2192_v42, %v1907_v40 }
0x138d   :  { %v1897_v36 = vmul.f32 %v2286_v32, %v1896_v50 }
0x138f   :  { %v1901_v38 = vsel %vm1900_vm4, %v2286_v32, %v1897_v36 }
0x1390   :  { %v1903_v39 = vmul.f32 %v1901_v38, %v1869_v61 }
0x1392   :  { %v1908_v41 = vmul.f32 %v2191_v10, %v1903_v39 }
0x1394   :  { %v1913_v43 = vadd.f32 %v2192_v42, %v1908_v41 }
0x1396   :  { %v1915_v44 = vrot.slane %v1913_v43, 7 }
0x1398   :  { %v1918_v45 = vsel %vm1917_vm5, %v1912_v8, %v1915_v44 }
0x1399   :  { %1920 = vst.msk [vmem:[#allocation11] sm:$0x3] %vm1919_vm6, %v1918_v45 }
0x139a   :  { %1931 = dma.vmem_to_hbm [thread:$0]  %s1927_s23, 32, %s1929_s29, [#allocation4]  }
0x139b   :  { %2437 = dma.done.wait [#allocation4], 32  }
0x139c   :  { %2438 = vsyncadd [#allocation4], 4294967264 }
0x139d   :  { %1936 = vsyncpa [#allocation3], 1 }
0x139e   :  { %1937 = vsyncpa [#allocation6], 1 }
0x139f   :  { %1938 = vsyncpa [#allocation9], 1 }
0x13a0   :  { %1939 = vsyncpa [#allocation4], 1 }

</bundles_post_ra>
